<compile_context>
chip_gen: v6e
topology: v6e:2x2x1
jax: 0.10.0
libtpu: 0.0.40
codegen_flags: <defaults>
</compile_context>

<pallas_src>
import functools

import jax
import jax.numpy as jnp
import numpy as np
from jax.experimental import pallas as pl
from jax.experimental.pallas import tpu as pltpu


def _round_up(x, m):
    return ((x + m - 1) // m) * m


def _attention_kernel(hidden_ref, enc_ref, wh_ref, we_ref, b_ref, v_ref, out_ref,
                      *, s_valid):
    # hidden_ref: [bB, Dd]  bf16      enc_ref: [bB, S_pad, F]  bf16
    # wh_ref:     [Dd, Dp]  bf16      we_ref:  [F, Dp]         bf16
    # b_ref:      [1, Dp]   f32       v_ref:   [1, Dp]         f32
    # out_ref:    [bB, S_pad] f32     (padded cols are written as 0, sliced off outside)
    bB, s_pad, f_dim = enc_ref.shape
    dp = wh_ref.shape[1]

    h = hidden_ref[...]                       # bf16
    enc = enc_ref[...]                        # bf16
    wh = wh_ref[...]
    we = we_ref[...]
    b = b_ref[...]                            # f32 [1, Dp]
    v = v_ref[...]                            # f32 [1, Dp]

    # hidden part of the split Linear (+ bias), computed once per batch tile:
    #   [bB, Dd] @ [Dd, Dp] -> [bB, Dp]  (f32 accumulate)
    h_proj = jnp.dot(h, wh, preferred_element_type=jnp.float32) + b

    # encoder part: flatten (bB, S_pad) -> rows so the MXU sees a large M and a
    # lane-aligned N:  [bB*S_pad, F] @ [F, Dp] -> [bB, S_pad, Dp]  (f32 accumulate)
    e_proj = jnp.dot(enc.reshape(bB * s_pad, f_dim), we,
                     preferred_element_type=jnp.float32).reshape(bB, s_pad, dp)

    # energy = tanh(cat @ W.T + b)            (EUP tanh, f32)
    energy = jnp.tanh(e_proj + h_proj[:, None, :])           # [bB, S_pad, Dp]

    # v projection (bias-free Linear to scalar) -> scores [bB, S_pad]
    # (lane-axis reduction over Dp; cheap at these sizes, keeps S on lanes)
    scores = jnp.sum(energy * v[None, :, :], axis=-1)

    # mask padded sequence positions (static compare; only emitted if padding exists)
    if s_valid < s_pad:
        col = jax.lax.broadcasted_iota(jnp.int32, (bB, s_pad), 1)
        scores = jnp.where(col < s_valid, scores, jnp.float32(-1e30))

    # softmax over the src_len (lane) axis; divide replaced by EUP approx reciprocal
    m = jnp.max(scores, axis=-1, keepdims=True)
    e = jnp.exp(scores - m)
    denom = jnp.sum(e, axis=-1, keepdims=True)
    out_ref[...] = e * pl.reciprocal(denom, approx=True)     # lane-dense full store


def attention_pallas(hidden, encoder_outputs, w_attn_t, b_attn, v_w):
    """hidden [B, Dd], encoder_outputs [B, S, 2*De],
    w_attn_t [Dd + 2*De, Dd] (pre-transposed Linear weight, rows ordered
    [hidden features ; encoder features]), b_attn [Dd], v_w [Dd]."""
    B, Dd = hidden.shape
    _, S, F = encoder_outputs.shape
    assert w_attn_t.shape == (Dd + F, Dd)

    Dp = _round_up(Dd, 128)          # lane-aligned matmul N (padded weight cols are 0)
    S_pad = _round_up(S, 128)        # lane-dense output / large aligned matmul M

    # Split and zero-pad the parameters (tiny, resident in VMEM across all steps).
    wh = jnp.pad(w_attn_t[:Dd, :], ((0, 0), (0, Dp - Dd))).astype(jnp.bfloat16)
    we = jnp.pad(w_attn_t[Dd:, :], ((0, 0), (0, Dp - Dd))).astype(jnp.bfloat16)
    b2 = jnp.pad(b_attn.astype(jnp.float32), (0, Dp - Dd)).reshape(1, Dp)
    v2 = jnp.pad(v_w.astype(jnp.float32), (0, Dp - Dd)).reshape(1, Dp)

    # bf16 inputs: halves HBM traffic on the dominant (encoder) operand.
    h_bf = hidden.astype(jnp.bfloat16)
    enc_bf = encoder_outputs.astype(jnp.bfloat16)
    if S_pad != S:
        enc_bf = jnp.pad(enc_bf, ((0, 0), (0, S_pad - S), (0, 0)))

    # Batch tile: multiple of 8 (sublane) when possible, else the whole (small) batch.
    bB = 8 if (B >= 8 and B % 8 == 0) else B
    grid = (pl.cdiv(B, bB),)

    kernel = functools.partial(_attention_kernel, s_valid=S)

    out_padded = pl.pallas_call(
        kernel,
        out_shape=jax.ShapeDtypeStruct((B, S_pad), jnp.float32),
        grid_spec=pltpu.PrefetchScalarGridSpec(
            num_scalar_prefetch=0,
            grid=grid,
            in_specs=[
                pl.BlockSpec((bB, Dd), lambda i: (i, 0)),            # hidden tile
                pl.BlockSpec((bB, S_pad, F), lambda i: (i, 0, 0)),   # encoder tile (pipelined)
                pl.BlockSpec((Dd, Dp), lambda i: (0, 0)),            # Wh (resident)
                pl.BlockSpec((F, Dp), lambda i: (0, 0)),             # We (resident)
                pl.BlockSpec((1, Dp), lambda i: (0, 0)),             # bias (resident)
                pl.BlockSpec((1, Dp), lambda i: (0, 0)),             # v   (resident)
            ],
            out_specs=pl.BlockSpec((bB, S_pad), lambda i: (i, 0)),
        ),
        compiler_params=pltpu.CompilerParams(
            dimension_semantics=("parallel",),     # megacore sharding on v7x
            vmem_limit_bytes=64 * 1024 * 1024,     # safe on v5e/v6e/v7x; headroom for tiles
        ),
    )(h_bf, enc_bf, wh, we, b2, v2)

    return out_padded[:, :S] if S_pad != S else out_padded


def attention_ref(hidden, encoder_outputs, w_attn_t, b_attn, v_w):
    """Pure-JAX reference matching the PyTorch forward (f32)."""
    B, Dd = hidden.shape
    S = encoder_outputs.shape[1]
    h_rep = jnp.broadcast_to(hidden[:, None, :], (B, S, Dd))
    energy_in = jnp.concatenate([h_rep, encoder_outputs], axis=2)
    energy = jnp.tanh(energy_in @ w_attn_t + b_attn)
    attention = jnp.einsum("bsd,d->bs", energy, v_w)
    return jax.nn.softmax(attention, axis=1)


if __name__ == "__main__":
    # Small shapes consistent with the module (batch tiled over a 2-step grid).
    B, S = 16, 8
    enc_hid, dec_hid = 16, 32
    Din = enc_hid * 2 + dec_hid

    key = jax.random.PRNGKey(0)
    k1, k2, k3, k4, k5 = jax.random.split(key, 5)

    hidden = jax.random.normal(k1, (B, dec_hid), dtype=jnp.float32)
    encoder_outputs = jax.random.normal(k2, (B, S, 2 * enc_hid), dtype=jnp.float32)

    # Deterministic parameter init (uniform ~ PyTorch Linear default scale).
    bound_attn = 1.0 / np.sqrt(Din)
    w_attn_t = jax.random.uniform(k3, (Din, dec_hid), jnp.float32,
                                  -bound_attn, bound_attn)   # rows: [hidden ; encoder]
    b_attn = jax.random.uniform(k4, (dec_hid,), jnp.float32, -bound_attn, bound_attn)
    bound_v = 1.0 / np.sqrt(dec_hid)
    v_w = jax.random.uniform(k5, (dec_hid,), jnp.float32, -bound_v, bound_v)

    out = attention_pallas(hidden, encoder_outputs, w_attn_t, b_attn, v_w)
    out = jax.block_until_ready(out)

    ref = attention_ref(hidden, encoder_outputs, w_attn_t, b_attn, v_w)
    # bf16 inputs + f32 accumulation + approx reciprocal -> modest tolerance vs f32 ref.
    np.testing.assert_allclose(np.asarray(out), np.asarray(ref), rtol=2e-2, atol=1e-2)
    assert out.shape == (B, S)
    np.testing.assert_allclose(np.asarray(out).sum(axis=1), np.ones(B), atol=3e-3)

    print("KERNEL_OK")
</pallas_src>

<mosaic_0001>
module attributes {stable_mosaic.version = 11 : i64} {
  func.func @_attention_kernel(%arg0: i32, %arg1: memref<8x32xbf16, #tpu.memory_space<vmem>>, %arg2: memref<8x128x32xbf16, #tpu.memory_space<vmem>>, %arg3: memref<32x128xbf16, #tpu.memory_space<vmem>>, %arg4: memref<32x128xbf16, #tpu.memory_space<vmem>>, %arg5: memref<1x128xf32, #tpu.memory_space<vmem>>, %arg6: memref<1x128xf32, #tpu.memory_space<vmem>>, %arg7: memref<8x128xf32, #tpu.memory_space<vmem>>) attributes {dimension_semantics = [#tpu.dimension_semantics<parallel>], iteration_bounds = array<i64: 2>, scalar_prefetch = 0 : i64, scratch_operands = 0 : i64, tpu.core_type = #tpu.core_type<tc>, window_params = [{transform_indices = @transform_0, window_bounds = array<i64: 8, 32>}, {transform_indices = @transform_1, window_bounds = array<i64: 8, 128, 32>}, {pipeline_mode = #tpu.pipeline_mode<synchronous>, transform_indices = @transform_2, window_bounds = array<i64: 32, 128>}, {pipeline_mode = #tpu.pipeline_mode<synchronous>, transform_indices = @transform_3, window_bounds = array<i64: 32, 128>}, {pipeline_mode = #tpu.pipeline_mode<synchronous>, transform_indices = @transform_4, window_bounds = array<i64: 1, 128>}, {pipeline_mode = #tpu.pipeline_mode<synchronous>, transform_indices = @transform_5, window_bounds = array<i64: 1, 128>}, {transform_indices = @transform_6, window_bounds = array<i64: 8, 128>}]} {
    %c0 = arith.constant 0 : index
    %c0_0 = arith.constant 0 : index
    %0 = vector.load %arg1[%c0, %c0_0] : memref<8x32xbf16, #tpu.memory_space<vmem>>, vector<8x32xbf16>
    %c0_1 = arith.constant 0 : index
    %c0_2 = arith.constant 0 : index
    %c0_3 = arith.constant 0 : index
    %1 = vector.load %arg2[%c0_1, %c0_2, %c0_3] : memref<8x128x32xbf16, #tpu.memory_space<vmem>>, vector<8x128x32xbf16>
    %c0_4 = arith.constant 0 : index
    %c0_5 = arith.constant 0 : index
    %2 = vector.load %arg3[%c0_4, %c0_5] : memref<32x128xbf16, #tpu.memory_space<vmem>>, vector<32x128xbf16>
    %c0_6 = arith.constant 0 : index
    %c0_7 = arith.constant 0 : index
    %3 = vector.load %arg4[%c0_6, %c0_7] : memref<32x128xbf16, #tpu.memory_space<vmem>>, vector<32x128xbf16>
    %c0_8 = arith.constant 0 : index
    %c0_9 = arith.constant 0 : index
    %4 = vector.load %arg5[%c0_8, %c0_9] : memref<1x128xf32, #tpu.memory_space<vmem>>, vector<1x128xf32>
    %c0_10 = arith.constant 0 : index
    %c0_11 = arith.constant 0 : index
    %5 = vector.load %arg6[%c0_10, %c0_11] : memref<1x128xf32, #tpu.memory_space<vmem>>, vector<1x128xf32>
    %cst = arith.constant dense<0.000000e+00> : vector<8x128xf32>
    %6 = tpu.matmul %0, %2, %cst {dimension_numbers = #tpu.dot_dimension_numbers<[1], [0], [0], [1], [0, 0, 1, 1], [], []>} : vector<8x32xbf16>, vector<32x128xbf16>, vector<8x128xf32> -> vector<8x128xf32>
    %7 = vector.broadcast %4 : vector<1x128xf32> to vector<8x128xf32>
    %8 = arith.addf %6, %7 : vector<8x128xf32>
    %9 = vector.shape_cast %1 : vector<8x128x32xbf16> to vector<1024x32xbf16>
    %cst_12 = arith.constant dense<0.000000e+00> : vector<1024x128xf32>
    %10 = tpu.matmul %9, %3, %cst_12 {dimension_numbers = #tpu.dot_dimension_numbers<[1], [0], [0], [1], [0, 0, 1, 1], [], []>} : vector<1024x32xbf16>, vector<32x128xbf16>, vector<1024x128xf32> -> vector<1024x128xf32>
    %11 = vector.shape_cast %10 : vector<1024x128xf32> to vector<8x128x128xf32>
    %12 = vector.shape_cast %8 : vector<8x128xf32> to vector<8x1x128xf32>
    %13 = vector.broadcast %12 : vector<8x1x128xf32> to vector<8x128x128xf32>
    %14 = arith.addf %11, %13 : vector<8x128x128xf32>
    %15 = math.tanh %14 : vector<8x128x128xf32>
    %16 = vector.shape_cast %5 : vector<1x128xf32> to vector<1x1x128xf32>
    %17 = vector.broadcast %16 : vector<1x1x128xf32> to vector<8x128x128xf32>
    %18 = arith.mulf %15, %17 : vector<8x128x128xf32>
    %cst_13 = arith.constant dense<0.000000e+00> : vector<8x128xf32>
    %19 = vector.multi_reduction <add>, %18, %cst_13 [2] : vector<8x128x128xf32> to vector<8x128xf32>
    %20 = tpu.iota {dimensions = array<i32: 1>} : vector<8x128xi32>
    %c8_i32 = arith.constant 8 : i32
    %21 = vector.broadcast %c8_i32 : i32 to vector<8x128xi32>
    %22 = arith.cmpi slt, %20, %21 : vector<8x128xi32>
    %cst_14 = arith.constant -1.000000e+30 : f32
    %23 = vector.broadcast %cst_14 : f32 to vector<8x128xf32>
    %24 = arith.select %22, %19, %23 : vector<8x128xi1>, vector<8x128xf32>
    %cst_15 = arith.constant dense<0xFF800000> : vector<8xf32>
    %25 = vector.multi_reduction <maximumf>, %24, %cst_15 [1] : vector<8x128xf32> to vector<8xf32>
    %26 = vector.shape_cast %25 : vector<8xf32> to vector<8x1xf32>
    %27 = vector.broadcast %26 : vector<8x1xf32> to vector<8x128xf32>
    %28 = arith.subf %24, %27 : vector<8x128xf32>
    %29 = math.exp %28 : vector<8x128xf32>
    %cst_16 = arith.constant dense<0.000000e+00> : vector<8xf32>
    %30 = vector.multi_reduction <add>, %29, %cst_16 [1] : vector<8x128xf32> to vector<8xf32>
    %31 = vector.shape_cast %30 : vector<8xf32> to vector<8x1xf32>
    %32 = tpu.reciprocal %31 {approx = true} : vector<8x1xf32> -> vector<8x1xf32>
    %33 = vector.broadcast %32 : vector<8x1xf32> to vector<8x128xf32>
    %34 = arith.mulf %29, %33 : vector<8x128xf32>
    %c0_17 = arith.constant 0 : index
    %c0_18 = arith.constant 0 : index
    %35 = vector.load %arg7[%c0_17, %c0_18] : memref<8x128xf32, #tpu.memory_space<vmem>>, vector<8x128xf32>
    tpu.vector_store %arg7[%c0_17, %c0_18], %34 {strides = array<i32>} : memref<8x128xf32, #tpu.memory_space<vmem>>, vector<8x128xf32>,
    return
  }
  func.func @transform_0(%arg0: i32) -> (i32, i32) {
    %c0_i32 = arith.constant 0 : i32
    %c0_i32_0 = arith.constant 0 : i32
    return %arg0, %c0_i32 : i32, i32
  }
  func.func @transform_1(%arg0: i32) -> (i32, i32, i32) {
    %c0_i32 = arith.constant 0 : i32
    %c0_i32_0 = arith.constant 0 : i32
    %c0_i32_1 = arith.constant 0 : i32
    return %arg0, %c0_i32, %c0_i32_0 : i32, i32, i32
  }
  func.func @transform_2(%arg0: i32) -> (i32, i32) {
    %c0_i32 = arith.constant 0 : i32
    %c0_i32_0 = arith.constant 0 : i32
    %c0_i32_1 = arith.constant 0 : i32
    return %c0_i32, %c0_i32_0 : i32, i32
  }
  func.func @transform_3(%arg0: i32) -> (i32, i32) {
    %c0_i32 = arith.constant 0 : i32
    %c0_i32_0 = arith.constant 0 : i32
    %c0_i32_1 = arith.constant 0 : i32
    return %c0_i32, %c0_i32_0 : i32, i32
  }
  func.func @transform_4(%arg0: i32) -> (i32, i32) {
    %c0_i32 = arith.constant 0 : i32
    %c0_i32_0 = arith.constant 0 : i32
    %c0_i32_1 = arith.constant 0 : i32
    return %c0_i32, %c0_i32_0 : i32, i32
  }
  func.func @transform_5(%arg0: i32) -> (i32, i32) {
    %c0_i32 = arith.constant 0 : i32
    %c0_i32_0 = arith.constant 0 : i32
    %c0_i32_1 = arith.constant 0 : i32
    return %c0_i32, %c0_i32_0 : i32, i32
  }
  func.func @transform_6(%arg0: i32) -> (i32, i32) {
    %c0_i32 = arith.constant 0 : i32
    %c0_i32_0 = arith.constant 0 : i32
    return %arg0, %c0_i32 : i32, i32
  }
}

</mosaic_0001>

<bundles_post_ra>
// kernel: tpu_custom_call.1
= control target key start
LH: loop header
LB: loop body
LE: loop exit
PB: predicated region body
PF: predicated region fallthrough
CT: control target
= control target key end

     0   :  { %11 = vsyncpa [#allocation3], 0  ;;  %s5279_s0 = inlined_call_operand.vmem [shape: bf16[16,32], index: 0, kind: input, shape index: {}]   ;;  %s5280_s1 = inlined_call_operand.vmem [shape: bf16[16,128,32], index: 1, kind: input, shape index: {}]   ;;  %s5281_s2 = inlined_call_operand.vmem [shape: bf16[32,128], index: 2, kind: input, shape index: {}]   ;;  %s5282_s3 = inlined_call_operand.vmem [shape: bf16[32,128], index: 3, kind: input, shape index: {}]   ;;  %s5283_s4 = inlined_call_operand.vmem [shape: f32[1,128], index: 4, kind: input, shape index: {}]   ;;  %s5284_s5 = inlined_call_operand.vmem [shape: f32[1,128], index: 5, kind: input, shape index: {}]   ;;  %s5285_s6 = inlined_call_operand.hbm [shape: f32[16,128], index: 6, kind: output, shape index: {}]  }
   0x1   :  { %13 = vsyncpa [#allocation3 + $0x1], 0  ;;  %s4017_s21 = smov 0   ;;  %s4019_s22 = smov 0  }
   0x2   :  { %s4021_s23 = smov 0   ;;  %s4023_s24 = smov 0  }
   0x3 LB: > { %s4038_s25 = sadd.s32 4294967295, %s3976_s24   ;;  %s3183_s26 = sadd.s32 4294967294, %s3976_s24   ;;  %s3976_s24 = sphi %s4023_s24, %s5291_s24   ;;  %s3972_s23 = sphi %s4021_s23, %s5290_s23   ;;  %s3968_s22 = sphi %s4019_s22, %s5289_s22   ;;  %s3964_s21 = sphi %s4017_s21, %s5288_s21  }
   0x4   : > { %s4042_s27 = sadd.s32 1, %s3976_s24   ;;  %s162_s28 = sadd.s32 1, %s3972_s23 }
   0x5   : > { %s159_s29 = ssub.s32 %s3976_s24, %s4042_s27  ;;  %p172_p0 = scmp.ne.s32.totalorder %s3972_s23, %s3968_s22 }
   0x6   : > { %p160_p1 = scmp.eq.s32.totalorder %s159_s29, 0  ;;  %p173_p2 = scmp.eq.s32.totalorder %s4038_s25, 1 }
   0x7   : > { %p178_p3 = scmp.ne.s32.totalorder %s3968_s22, %s3964_s21  ;;  %p179_p4 = scmp.eq.s32.totalorder %s3183_s26, 1 }
   0x8   : > { %s4053_s30 = scalar_select %p160_p1, %s3972_s23, %s162_s28  }
   0x9   : > { %p4055_p5 = por %p173_p2, %p172_p0  ;;  %p4059_p6 = por %p179_p4, %p178_p3 }
   0xa   : > { %p3186_p7 = scmp.ge.s32.totalorder %s3976_s24, 1  ;;  %p226_p8 = scmp.lt.s32.totalorder %s3976_s24, 3 }
   0xc   : > { %p227_p9 = pnand %p3186_p7, %p226_p8 }
   0xd   : > { %p261_p10 = scmp.lt.s32.totalorder (!%p227_p9), %s4038_s25, 1  ;;  %s3189_s18 = sshll.u32 (!%p227_p9), %s4038_s25, 3 }
   0xe   : > { %230 = sbr.rel (%p227_p9) target bundleno = 968 (0x3c8), region = 44  ;;  %p266_p11 = scmp.lt.s32.totalorder (!%p227_p9), %s3189_s18, 15 }
   0xf   : > { %s3328_s20 = sshll.u32 (!%p227_p9), %s4038_s25, 7  ;;  %s3981_s13 = smov (!%p227_p9), [#allocation2]  }
  0x10   : > { %s3110_s10 = scalar_lea.hbm (!%p227_p9), %s5285_s6, %s3328_s20  ;;  %s3920_s14 = sshll.u32 (!%p227_p9), %s3981_s13, 4  ;;  %s3921_s14 = int_to_ptr.vmem [resolvable:$false] %s3920_s14 }
  0x13   : > { %v3587_v0 = vld [vmem:[%s5281_s2 + $0x8] sm:$0xff]   ;;  %v3978_v1 = vmov 0.0   ;;  %v3589_v3 = vld [vmem:[%s5281_s2] sm:$0xff]   ;;  %vm3979_vm0 = vmmov 0   ;;  %s262_s17 = scalar_select %p261_p10, %s4038_s25, 1  ;;  %vm430_vm1 = vcmask 261120  }
  0x14   : > { %3401 = vmatprep.subr.bf16.mxu0 %v3978_v1  ;;  %v3588_v2 = vld [vmem:[%s5282_s3 + $0x8] sm:$0xff]   ;;  %3405 = vmatprep.mubr.msk.bf16.mxu0 %vm3979_vm0, %v3978_v1  ;;  %v3590_v4 = vld [vmem:[%s5282_s3] sm:$0xff]   ;;  %s5293_s18 = smov (!%p266_p11, %s3189_s18), 15  ;;  %vm2419_vm2 = vcmask 130112   ;;  %vm2426_vm3 = vcmask 195712   ;;  %vm2433_vm4 = vcmask 261312  }
  0x15   : > { %3402 = vmatpush3.bf16.msra.mxu0 %v3587_v0  ;;  %3541 = vmatprep.subr.bf16.mxu1 %v3588_v2  ;;  %s3188_s19 = sshll.u32 %s262_s17, 2  ;;  %s3331_s29 = sshll.u32 %s5293_s18, 6  ;;  %vm2440_vm5 = vcmask 326912   ;;  %vm2447_vm6 = vcmask 392512   ;;  %vm2454_vm7 = vcmask 458112   ;;  %vm2461_vm8 = vcmask 523712  }
  0x16   : > { %3403 = vmatprep.subr.bf16.mxu0 %v3978_v1  ;;  %3543 = vmatpush3.bf16.msra.mxu1 %v3588_v2  ;;  %s264_s28 = scalar_lea.vmem %s5279_s0, %s3188_s19  ;;  %s4087_s11 = scalar_lea.vmem %s5280_s1, %s3331_s29  ;;  %vm2468_vm9 = vcmask 589312   ;;  %vm2475_vm10 = vcmask 654912   ;;  %vm2482_vm11 = vcmask 720512   ;;  %vm2489_vm12 = vcmask 786112  }
  0x17   : > { %3542 = vmatprep.subr.bf16.mxu1 %v3590_v4  ;;  %v273_v5 = vld [vmem:[%s264_s28] sm:$0xf]  ;;  %v3591_v6 = vld [vmem:[%s4087_s11 + $0xf0] sm:$0xff]   ;;  %v3592_v7 = vld [vmem:[%s4087_s11 + $0xf8] sm:$0xff]   ;;  %vm2496_vm13 = vcmask 851712   ;;  %vm2503_vm14 = vcmask 917312  }
  0x18   : > { %3473 = vmatprep.mubr.msk.bf16.mxu1 %vm430_vm1, %v3591_v6  ;;  %v3593_v8 = vld [vmem:[%s4087_s11] sm:$0xff]   ;;  %v3594_v9 = vld [vmem:[%s4087_s11 + $0x8] sm:$0xff]   ;;  %v3597_v11 = vld [vmem:[%s4087_s11 + $0x10] sm:$0xff]   ;;  %v3980_v6 = vmov 1966171168   ;;  %vm2510_vm15 = vcmask 982912  }
  0x19   : > { %3404 = vmatpush3.bf16.msra.mxu0 %v3589_v3  ;;  %v3595_v10 = vld [vmem:[%s4087_s11 + $0x100] sm:$0xff]   ;;  %v3596_v12 = vld [vmem:[%s4087_s11 + $0x108] sm:$0xff]   ;;  %v3599_v13 = vld [vmem:[%s4087_s11 + $0x110] sm:$0xff]   ;;  %vm2517_vm0 = vcmask 1048512   ;;  %s258_s18 = sand.u32 1, %s3968_s22   ;;  %s3922_s25 = scalar_lea.vmem %s3921_s14, 256 }
  0x1a   : > { %3409 = vmatprep.subr.bf16.mxu0 %v3588_v2  ;;  %3544 = vmatpush3.bf16.msra.mxu1 %v3590_v4  ;;  %v3598_v14 = vld [vmem:[%s4087_s11 + $0x18] sm:$0xff]   ;;  %v3601_v15 = vld [vmem:[%s4087_s11 + $0x20] sm:$0xff]   ;;  %v3602_v18 = vld [vmem:[%s4087_s11 + $0x28] sm:$0xff]   ;;  %s3187_s19 = sshll.u32 %s258_s18, 3 }
  0x1b   : > { %v3600_v16 = vld [vmem:[%s4087_s11 + $0x118] sm:$0xff]   ;;  %v3603_v17 = vld [vmem:[%s4087_s11 + $0x120] sm:$0xff]   ;;  %v3605_v19 = vld [vmem:[%s4087_s11 + $0x30] sm:$0xff]   ;;  %s260_s26 = scalar_lea.vmem [#allocation2], %s3187_s19 }
  0x1c   : > { %3406 = vmatmul.mubr.msk.bf16.vlgmr.msra.gmra.mxu0 %vm430_vm1, %v273_v5  ;;  %v3604_v20 = vld [vmem:[%s4087_s11 + $0x128] sm:$0xff]   ;;  %v3607_v21 = vld [vmem:[%s4087_s11 + $0x130] sm:$0xff]   ;;  %v3606_v22 = vld [vmem:[%s4087_s11 + $0x38] sm:$0xff]   ;;  %s3112_s28 = sshll.u32 %s260_s26, 4  ;;  %s3113_s28 = int_to_ptr.vmem [resolvable:$true] %s3112_s28 }
  0x1d   : > { %3410 = vmatpush3.bf16.msra.mxu0 %v3588_v2  ;;  %3474 = vmatmul.mubr.msk.bf16.vlgmr.msra.gmra.mxu1 %vm430_vm1, %v3592_v7  ;;  %v3609_v23 = vld [vmem:[%s4087_s11 + $0x40] sm:$0xff]   ;;  %v3608_v24 = vld [vmem:[%s4087_s11 + $0x138] sm:$0xff]   ;;  %v3610_v26 = vld [vmem:[%s4087_s11 + $0x48] sm:$0xff]   ;;  %v1546_v7 = vunpack.c.l.s4 %v3980_v6  ;;  %s3916_s12 = scalar_lea.vmem %s3113_s28, 128  ;;  %p3923_p1 = scmp.lt.s32.totalorder %s3113_s28, %s3921_s14 }
  0x1e   : > { %3411 = vmatprep.subr.bf16.mxu0 %v3590_v4  ;;  %3413 = vmatprep.mubr.msk.bf16.mxu0 %vm430_vm1, %v3593_v8  ;;  %v3611_v25 = vld [vmem:[%s4087_s11 + $0x140] sm:$0xff]   ;;  %v3613_v27 = vld [vmem:[%s4087_s11 + $0x50] sm:$0xff]   ;;  %v3612_v28 = vld [vmem:[%s4087_s11 + $0x148] sm:$0xff]   ;;  %v1548_v8 = vlaneseq  ;;  %p3917_p12 = scmp.ne.s32.totalorder %s3113_s28, %s3916_s12  ;;  %p3924_p2 = scmp.lt.s32.totalorder %s3922_s25, %s3916_s12 }
  0x1f   : > { %3477 = vmatprep.mubr.msk.bf16.mxu1 %vm430_vm1, %v3595_v10  ;;  %v3615_v29 = vld [vmem:[%s4087_s11 + $0x150] sm:$0xff]   ;;  %v3614_v30 = vld [vmem:[%s4087_s11 + $0x58] sm:$0xff]   ;;  %v3617_v31 = vld [vmem:[%s4087_s11 + $0x60] sm:$0xff]  }
  0x20   : > { %v3616_v32 = vld [vmem:[%s4087_s11 + $0x158] sm:$0xff]   ;;  %v3619_v33 = vld [vmem:[%s4087_s11 + $0x160] sm:$0xff]   ;;  %v3618_v34 = vld [vmem:[%s4087_s11 + $0x68] sm:$0xff]   ;;  %v4218_v10 = vshrl.u32 %v1548_v8, 7  ;;  %p3918_p13 = pnand %p3917_p12, %p4055_p5  ;;  %p3925_p3 = por %p3924_p2, %p3923_p1 }
  0x21   : > { %3412 = vmatpush3.bf16.msra.mxu0 %v3590_v4  ;;  %v3621_v35 = vld [vmem:[%s4087_s11 + $0x70] sm:$0xff]   ;;  %v3620_v36 = vld [vmem:[%s4087_s11 + $0x168] sm:$0xff]   ;;  %v3622_v38 = vld [vmem:[%s4087_s11 + $0x78] sm:$0xff]  }
  0x22   : > { %v3623_v37 = vld [vmem:[%s4087_s11 + $0x170] sm:$0xff]   ;;  %v3625_v39 = vld [vmem:[%s4087_s11 + $0x80] sm:$0xff]   ;;  %v3624_v40 = vld [vmem:[%s4087_s11 + $0x178] sm:$0xff]   ;;  %p3919_p0 = pneg %p3918_p13 }
  0x23   : > { %v3627_v41 = vld [vmem:[%s4087_s11 + $0x180] sm:$0xff]   ;;  %v3626_v42 = vld [vmem:[%s4087_s11 + $0x88] sm:$0xff]   ;;  %v3629_v43 = vld [vmem:[%s4087_s11 + $0x90] sm:$0xff]  }
  0x24   : > { %3414 = vmatmul.mubr.msk.bf16.vlgmr.msra.gmra.mxu0 %vm430_vm1, %v3594_v9  ;;  %v3628_v44 = vld [vmem:[%s4087_s11 + $0x188] sm:$0xff]   ;;  %v3631_v45 = vld [vmem:[%s4087_s11 + $0x190] sm:$0xff]   ;;  %v3630_v46 = vld [vmem:[%s4087_s11 + $0x98] sm:$0xff]   ;;  %v1547_v9 = vunpack.c.0.s8 %v1546_v7  ;;  %p3926_p4 = pnand %p3925_p3, %p3919_p0 }
  0x25   : > { %3417 = vmatprep.mubr.msk.bf16.mxu0 %vm430_vm1, %v3597_v11  ;;  %3478 = vmatmul.mubr.msk.bf16.gmra.mxu1 %vm430_vm1, %v3596_v12  ;;  %v3633_v47 = vld [vmem:[%s4087_s11 + $0xa0] sm:$0xff]   ;;  %v3632_v48 = vld [vmem:[%s4087_s11 + $0x198] sm:$0xff]   ;;  %v3634_v50 = vld [vmem:[%s4087_s11 + $0xa8] sm:$0xff]  }
  0x26   : > { %3481 = vmatprep.mubr.msk.bf16.mxu1 %vm430_vm1, %v3599_v13  ;;  %v3635_v49 = vld [vmem:[%s4087_s11 + $0x1a0] sm:$0xff]   ;;  %v3637_v51 = vld [vmem:[%s4087_s11 + $0xb0] sm:$0xff]   ;;  %v3636_v52 = vld [vmem:[%s4087_s11 + $0x1a8] sm:$0xff]   ;;  %v1550_v12 = vsub.s32 %v1547_v9, %v4218_v10 }
  0x27   : > { %v3639_v53 = vld [vmem:[%s4087_s11 + $0x1b0] sm:$0xff]   ;;  %v3638_v54 = vld [vmem:[%s4087_s11 + $0xb8] sm:$0xff]   ;;  %v3641_v55 = vld [vmem:[%s4087_s11 + $0xc0] sm:$0xff]  }
  0x28   : > { %v3640_v56 = vld [vmem:[%s4087_s11 + $0x1b8] sm:$0xff]   ;;  %v3643_v57 = vld [vmem:[%s4087_s11 + $0x1c0] sm:$0xff]   ;;  %v3642_v58 = vld [vmem:[%s4087_s11 + $0xc8] sm:$0xff]  }
  0x29   : > { %v3645_v59 = vld [vmem:[%s4087_s11 + $0xd0] sm:$0xff]   ;;  %v3644_v60 = vld [vmem:[%s4087_s11 + $0x1c8] sm:$0xff]   ;;  %v3646_v62 = vld [vmem:[%s4087_s11 + $0xd8] sm:$0xff]  }
  0x2a   : > { %v3647_v61 = vld [vmem:[%s4087_s11 + $0x1d0] sm:$0xff]   ;;  %v3649_v63 = vld [vmem:[%s4087_s11 + $0xe0] sm:$0xff]   ;;  %v3648_v0 = vld [vmem:[%s4087_s11 + $0x1d8] sm:$0xff]  }
  0x2b   : > { %v3651_v1 = vld [vmem:[%s4087_s11 + $0x1e0] sm:$0xff]   ;;  %v3650_v2 = vld [vmem:[%s4087_s11 + $0xe8] sm:$0xff]   ;;  %v3653_v4 = vld [vmem:[%s4087_s11 + $0x1f0] sm:$0xff]  }
  0x2c   : > { %3418 = vmatmul.mubr.msk.bf16.gmra.mxu0 %vm430_vm1, %v3598_v14  ;;  %v3652_v3 = vld [vmem:[%s4087_s11 + $0x1e8] sm:$0xff]   ;;  %v3654_v5 = vld [vmem:[%s4087_s11 + $0x1f8] sm:$0xff]   ;;  %v3192_v11 = vld [vmem:[%s5283_s4] ss:$0 sm:$0xff]  ;;  %s3099_s11 = scalar_lea.sflag [#allocation3], %s258_s18 }
  0x2d   : > { %3421 = vmatprep.mubr.msk.bf16.mxu0 %vm430_vm1, %v3601_v15  ;;  %3482 = vmatmul.mubr.msk.bf16.gmra.mxu1 %vm430_vm1, %v3600_v16 }
  0x2e   : > { %3485 = vmatprep.mubr.msk.bf16.mxu1 %vm430_vm1, %v3603_v17 }
  0x34   : > { %3422 = vmatmul.mubr.msk.bf16.gmra.mxu0 %vm430_vm1, %v3602_v18  ;;  %v4225_v18 = vsub.s32 0, %v4218_v10 }
  0x35   : > { %3425 = vmatprep.mubr.msk.bf16.mxu0 %vm430_vm1, %v3605_v19  ;;  %3486 = vmatmul.mubr.msk.bf16.gmra.mxu1 %vm430_vm1, %v3604_v20 }
  0x36   : > { %3489 = vmatprep.mubr.msk.bf16.mxu1 %vm430_vm1, %v3607_v21 }
  0x3c   : > { %3426 = vmatmul.mubr.msk.bf16.gmra.mxu0 %vm430_vm1, %v3606_v22 }
  0x3d   : > { %3429 = vmatprep.mubr.msk.bf16.mxu0 %vm430_vm1, %v3609_v23  ;;  %3490 = vmatmul.mubr.msk.bf16.gmra.mxu1 %vm430_vm1, %v3608_v24 }
  0x3e   : > { %3493 = vmatprep.mubr.msk.bf16.mxu1 %vm430_vm1, %v3611_v25 }
  0x44   : > { %3430 = vmatmul.mubr.msk.bf16.gmra.mxu0 %vm430_vm1, %v3610_v26 }
  0x45   : > { %3433 = vmatprep.mubr.msk.bf16.mxu0 %vm430_vm1, %v3613_v27  ;;  %3494 = vmatmul.mubr.msk.bf16.gmra.mxu1 %vm430_vm1, %v3612_v28 }
  0x46   : > { %3497 = vmatprep.mubr.msk.bf16.mxu1 %vm430_vm1, %v3615_v29 }
  0x4c   : > { %3434 = vmatmul.mubr.msk.bf16.gmra.mxu0 %vm430_vm1, %v3614_v30 }
  0x4d   : > { %3437 = vmatprep.mubr.msk.bf16.mxu0 %vm430_vm1, %v3617_v31  ;;  %3498 = vmatmul.mubr.msk.bf16.gmra.mxu1 %vm430_vm1, %v3616_v32 }
  0x4e   : > { %3501 = vmatprep.mubr.msk.bf16.mxu1 %vm430_vm1, %v3619_v33 }
  0x54   : > { %3438 = vmatmul.mubr.msk.bf16.gmra.mxu0 %vm430_vm1, %v3618_v34 }
  0x55   : > { %3441 = vmatprep.mubr.msk.bf16.mxu0 %vm430_vm1, %v3621_v35  ;;  %3502 = vmatmul.mubr.msk.bf16.gmra.mxu1 %vm430_vm1, %v3620_v36 }
  0x56   : > { %3505 = vmatprep.mubr.msk.bf16.mxu1 %vm430_vm1, %v3623_v37 }
  0x5c   : > { %3442 = vmatmul.mubr.msk.bf16.gmra.mxu0 %vm430_vm1, %v3622_v38 }
  0x5d   : > { %3445 = vmatprep.mubr.msk.bf16.mxu0 %vm430_vm1, %v3625_v39  ;;  %3506 = vmatmul.mubr.msk.bf16.gmra.mxu1 %vm430_vm1, %v3624_v40 }
  0x5e   : > { %3509 = vmatprep.mubr.msk.bf16.mxu1 %vm430_vm1, %v3627_v41 }
  0x64   : > { %3446 = vmatmul.mubr.msk.bf16.gmra.mxu0 %vm430_vm1, %v3626_v42 }
  0x65   : > { %3449 = vmatprep.mubr.msk.bf16.mxu0 %vm430_vm1, %v3629_v43  ;;  %3510 = vmatmul.mubr.msk.bf16.gmra.mxu1 %vm430_vm1, %v3628_v44 }
  0x66   : > { %3513 = vmatprep.mubr.msk.bf16.mxu1 %vm430_vm1, %v3631_v45 }
  0x6c   : > { %3450 = vmatmul.mubr.msk.bf16.gmra.mxu0 %vm430_vm1, %v3630_v46 }
  0x6d   : > { %3453 = vmatprep.mubr.msk.bf16.mxu0 %vm430_vm1, %v3633_v47  ;;  %3514 = vmatmul.mubr.msk.bf16.gmra.mxu1 %vm430_vm1, %v3632_v48 }
  0x6e   : > { %3517 = vmatprep.mubr.msk.bf16.mxu1 %vm430_vm1, %v3635_v49 }
  0x74   : > { %3454 = vmatmul.mubr.msk.bf16.gmra.mxu0 %vm430_vm1, %v3634_v50 }
  0x75   : > { %3457 = vmatprep.mubr.msk.bf16.mxu0 %vm430_vm1, %v3637_v51  ;;  %3518 = vmatmul.mubr.msk.bf16.gmra.mxu1 %vm430_vm1, %v3636_v52 }
  0x76   : > { %3521 = vmatprep.mubr.msk.bf16.mxu1 %vm430_vm1, %v3639_v53 }
  0x7c   : > { %3458 = vmatmul.mubr.msk.bf16.gmra.mxu0 %vm430_vm1, %v3638_v54 }
  0x7d   : > { %3461 = vmatprep.mubr.msk.bf16.mxu0 %vm430_vm1, %v3641_v55  ;;  %3522 = vmatmul.mubr.msk.bf16.gmra.mxu1 %vm430_vm1, %v3640_v56 }
  0x7e   : > { %3525 = vmatprep.mubr.msk.bf16.mxu1 %vm430_vm1, %v3643_v57 }
  0x84   : > { %3462 = vmatmul.mubr.msk.bf16.gmra.mxu0 %vm430_vm1, %v3642_v58 }
  0x85   : > { %3465 = vmatprep.mubr.msk.bf16.mxu0 %vm430_vm1, %v3645_v59  ;;  %3526 = vmatmul.mubr.msk.bf16.gmra.mxu1 %vm430_vm1, %v3644_v60 }
  0x86   : > { %3529 = vmatprep.mubr.msk.bf16.mxu1 %vm430_vm1, %v3647_v61 }
  0x8c   : > { %3466 = vmatmul.mubr.msk.bf16.gmra.mxu0 %vm430_vm1, %v3646_v62 }
  0x8d   : > { %3469 = vmatprep.mubr.msk.bf16.mxu0 %vm430_vm1, %v3649_v63  ;;  %3530 = vmatmul.mubr.msk.bf16.gmra.mxu1 %vm430_vm1, %v3648_v0  ;;  %v4268_v63 = vld [vmem:[%s5284_s5] ss:$0 sm:$0xff] }
  0x8e   : > { %3533 = vmatprep.mubr.msk.bf16.mxu1 %vm430_vm1, %v3651_v1 }
  0x94   : > { %3470 = vmatmul.mubr.msk.bf16.gmra.mxu0 %vm430_vm1, %v3650_v2 }
  0x95   : > { %3534 = vmatmul.mubr.msk.bf16.gmra.mxu1 %vm430_vm1, %v3652_v3 }
  0x96   : > { %3537 = vmatprep.mubr.msk.bf16.mxu1 %vm430_vm1, %v3653_v4 }
  0x9d   : > { %3538 = vmatmul.mubr.msk.bf16.gmra.mxu1 %vm430_vm1, %v3654_v5  ;;  %vm3072_vm1 = vcmask 1041409  }
  0xdc   : > { %v468_v13 = vpop.f32.mrf.mxu0 }
  0xdd   : > { %v469_v14 = vadd.f32 %v3192_v11, %v468_v13  ;;  %v3475_v23 = vpop.f32.mrf.mxu1 }
  0xde   : > { %v3407_v15 = vpop.f32.mrf.mxu0 }
  0xdf   : > { %v1544_v16 = vcombine.high %v469_v14, %v469_v14  ;;  %v1551_v17 = vrot.slane %v469_v14, %v1550_v12  ;;  %v1272_v30 = vpop.f32.mrf.mxu1 }
  0xe0   : > { %v471_v19 = vpop.f32.mrf.mxu0 }
  0xe1   : > { %v1558_v20 = vrot.slane %v1544_v16, %v1550_v12  ;;  %v1559_v21 = vcombine.high %v1551_v17, %v1551_v17  ;;  %v1567_v22 = vrot.slane %v1551_v17, %v1550_v12  ;;  %v3476_v35 = vpop.f32.mrf.mxu1 }
  0xe2   : > { %v3408_v24 = vpop.f32.mrf.mxu0 }
  0xe3   : > { %v1560_v25 = vcombine.high %v1558_v20, %v1558_v20  ;;  %v1574_v26 = vrot.slane %v1558_v20, %v1550_v12  ;;  %v4227_v27 = vrot.slane %v1559_v21, %v1550_v12  ;;  %v1589_v28 = vcombine.high %v1567_v22, %v1567_v22  ;;  %v1275_v42 = vpop.f32.mrf.mxu1 }
  0xe4   : > { %v4230_v29 = vrot.slane %v1567_v22, %v4225_v18  ;;  %v3415_v31 = vpop.f32.mrf.mxu0 }
  0xe5   : > { %v4232_v32 = vrot.slane %v1560_v25, %v1550_v12  ;;  %v1590_v33 = vcombine.high %v1574_v26, %v1574_v26  ;;  %v4235_v34 = vrot.slane %v1589_v28, %v4225_v18  ;;  %v1591_v38 = vcombine.high %v4227_v27, %v4227_v27  ;;  %v3479_v46 = vpop.f32.mrf.mxu1 }
  0xe6   : > { %v1635_v36 = vadd.f32 %v3415_v31, %v4230_v29  ;;  %v1032_v37 = vpop.f32.mrf.mxu0  ;;  %v4243_v40 = vrot.slane %v1574_v26, %v4225_v18 }
  0xe7   : > { %v1592_v39 = vcombine.high %v4232_v32, %v4232_v32  ;;  %v4246_v41 = vrot.slane %v1590_v33, %v4225_v18  ;;  %v1633_v43 = vadd.f32 %v4230_v29, %v1032_v37  ;;  %v4253_v48 = vrot.slane %v1591_v38, %v4225_v18  ;;  %v1288_v50 = vpop.f32.mrf.mxu1 }
  0xe8   : > { %3655 = vtanh.f32 %v1635_v36  ;;  %v3416_v44 = vpop.f32.mrf.mxu0  ;;  %v1699_v49 = vadd.f32 %v3479_v46, %v4243_v40  ;;  %v1697_v52 = vadd.f32 %v4243_v40, %v1288_v50 }
  0xe9   : > { %v4250_v45 = vrot.slane %v1592_v39, %v4225_v18  ;;  %3657 = vtanh.f32 %v1633_v43  ;;  %v1636_v53 = vadd.f32 %v3416_v44, %v4230_v29  ;;  %v3480_v54 = vpop.f32.mrf.mxu1  ;;  %v1693_v56 = vadd.f32 %v4253_v48, %v1272_v30 }
  0xea   : > { %v1035_v47 = vpop.f32.mrf.mxu0  ;;  %3659 = vtanh.f32 %v1699_v49  ;;  %v1696_v59 = vadd.f32 %v3476_v35, %v4253_v48  ;;  %v1694_v62 = vadd.f32 %v4253_v48, %v1275_v42  ;;  %v1695_v9 = vadd.f32 %v3475_v23, %v4253_v48 }
  0xeb   : > { %3661 = vtanh.f32 %v1697_v52  ;;  %v1291_v57 = vpop.f32.mrf.mxu1  ;;  %v1700_v17 = vadd.f32 %v3480_v54, %v4243_v40  ;;  %v1634_v28 = vadd.f32 %v4230_v29, %v1035_v47 }
  0xec   : > { %v4256_v51 = vpop.f32.mrf.mxu0  ;;  %3663 = vtanh.f32 %v1636_v53  ;;  %v1698_v42 = vadd.f32 %v4243_v40, %v1291_v57 }
  0xed   : > { %v3483_v60 = vpop.f32.mrf.mxu1  ;;  %3665 = vtanh.f32 %v1693_v56  ;;  %v1639_v54 = vadd.f32 %v4256_v51, %v4230_v29 }
  0xee   : > { %v1048_v55 = vpop.f32.mrf.mxu0  ;;  %3667 = vtanh.f32 %v1696_v59  ;;  %v1703_v3 = vadd.f32 %v3483_v60, %v4243_v40 }
  0xef   : > { %v4270_v0 = vpop.f32.mrf.mxu1  ;;  %3669 = vtanh.f32 %v1694_v62  ;;  %v1637_v13 = vadd.f32 %v4230_v29, %v1048_v55 }
  0xf0   : > { %v4261_v58 = vpop.f32.mrf.mxu0  ;;  %3671 = vtanh.f32 %v1703_v3  ;;  %v1701_v51 = vadd.f32 %v4243_v40, %v4270_v0 }
  0xf1   : > { %v3484_v4 = vpop.f32.mrf.mxu1  ;;  %3673 = vtanh.f32 %v1695_v9  ;;  %v1640_v0 = vadd.f32 %v4261_v58, %v4230_v29 }
  0xf2   : > { %v1051_v61 = vpop.f32.mrf.mxu0  ;;  %3675 = vtanh.f32 %v1637_v13  ;;  %v1704_v23 = vadd.f32 %v3484_v4, %v4243_v40 }
  0xf3   : > { %v1307_v11 = vpop.f32.mrf.mxu1  ;;  %3677 = vtanh.f32 %v1700_v17  ;;  %v1638_v36 = vadd.f32 %v4230_v29, %v1051_v61 }
  0xf4   : > { %v4272_v1 = vpop.f32.mrf.mxu0  ;;  %3679 = vtanh.f32 %v1704_v23  ;;  %v1702_v49 = vadd.f32 %v4243_v40, %v1307_v11 }
  0xf5   : > { %v3656_v2 = vpop.eup %3655  ;;  %v3487_v14 = vpop.f32.mrf.mxu1  ;;  %3681 = vtanh.f32 %v1634_v28  ;;  %v1643_v60 = vadd.f32 %v4272_v1, %v4230_v29 }
  0xf6   : > { %v4275_v5 = vpop.f32.mrf.mxu0  ;;  %v1897_v6 = vmul.f32 %v3656_v2, %v4268_v63  ;;  %v3658_v7 = vpop.eup %3657  ;;  %3683 = vtanh.f32 %v1638_v36  ;;  %v1707_v1 = vadd.f32 %v3487_v14, %v4243_v40 }
  0xf7   : > { %v1895_v16 = vmul.f32 %v3658_v7, %v4268_v63  ;;  %v3660_v19 = vpop.eup %3659  ;;  %v4286_v20 = vpop.f32.mrf.mxu1  ;;  %3685 = vtanh.f32 %v1698_v42  ;;  %v1641_v14 = vadd.f32 %v4230_v29, %v4275_v5 }
  0xf8   : > { %2027 = vadd.xlane.f32.xlu0 %v1897_v6  ;;  %v4279_v12 = vpop.f32.mrf.mxu0  ;;  %v3662_v22 = vpop.eup %3661  ;;  %v1961_v24 = vmul.f32 %v3660_v19, %v4268_v63  ;;  %3687 = vtanh.f32 %v1702_v49 }
  0xf9   : > { %v3664_v25 = vpop.eup %3663  ;;  %v4292_v26 = vpop.f32.mrf.mxu1  ;;  %v1959_v37 = vmul.f32 %v3662_v22, %v4268_v63  ;;  %3689 = vtanh.f32 %v1639_v54 }
  0xfa   : > { %v4282_v15 = vpop.f32.mrf.mxu0  ;;  %2155 = vadd.xlane.f32.xlu1 %v1961_v24  ;;  %v1898_v31 = vmul.f32 %v3664_v25, %v4268_v63  ;;  %v3666_v33 = vpop.eup %3665  ;;  %3691 = vtanh.f32 %v1643_v60 }
  0xfb   : > { %v4298_v35 = vpop.f32.mrf.mxu1  ;;  %v3668_v38 = vpop.eup %3667  ;;  %v1955_v44 = vmul.f32 %v3666_v33, %v4268_v63  ;;  %3693 = vtanh.f32 %v1701_v51 }
  0xfc   : > { %2023 = vadd.xlane.f32.xlu0 %v1895_v16  ;;  %v4288_v21 = vpop.f32.mrf.mxu0  ;;  %v3670_v46 = vpop.eup %3669  ;;  %v1958_v50 = vmul.f32 %v3668_v38, %v4268_v63  ;;  %3695 = vtanh.f32 %v1707_v1 }
  0xfd   : > { %v3491_v39 = vpop.f32.mrf.mxu1  ;;  %v3672_v52 = vpop.eup %3671  ;;  %v1956_v56 = vmul.f32 %v3670_v46, %v4268_v63  ;;  %3697 = vtanh.f32 %v1640_v0 }
  0xfe   : > { %v4295_v30 = vpop.f32.mrf.mxu0  ;;  %2151 = vadd.xlane.f32.xlu1 %v1959_v37  ;;  %v3674_v57 = vpop.eup %3673  ;;  %v1965_v61 = vmul.f32 %v3672_v52, %v4268_v63  ;;  %v1711_v58 = vadd.f32 %v3491_v39, %v4243_v40  ;;  %3699 = vtanh.f32 %v1641_v14  ;;  %v1705_v37 = vadd.f32 %v4243_v40, %v4286_v20 }
  0xff   : > { %v4306_v47 = vpop.f32.mrf.mxu1  ;;  %v3676_v62 = vpop.eup %3675  ;;  %v1957_v4 = vmul.f32 %v3674_v57, %v4268_v63  ;;  %v4358_v20 = vrot.slane %v4232_v32, %v4225_v18  ;;  %v1644_v52 = vadd.f32 %v4279_v12, %v4230_v29  ;;  %v1708_v12 = vadd.f32 %v4292_v26, %v4243_v40 }
 0x100   : > { %2029 = vadd.xlane.f32.xlu0 %v1898_v31  ;;  %v4303_v43 = vpop.f32.mrf.mxu0  ;;  %v3678_v6 = vpop.eup %3677  ;;  %v1899_v9 = vmul.f32 %v3676_v62, %v4268_v63  ;;  %3701 = vtanh.f32 %v1711_v58  ;;  %v1642_v26 = vadd.f32 %v4230_v29, %v4282_v15  ;;  %v1706_v15 = vadd.f32 %v4243_v40, %v4298_v35 }
 0x101   : > { %v3492_v53 = vpop.f32.mrf.mxu1  ;;  %v3680_v11 = vpop.eup %3679  ;;  %v1962_v17 = vmul.f32 %v3678_v6, %v4268_v63  ;;  %3703 = vtanh.f32 %v1705_v37  ;;  %v1647_v35 = vadd.f32 %v4288_v21, %v4230_v29  ;;  %v1645_v21 = vadd.f32 %v4230_v29, %v4295_v30 }
 0x102   : > { %2149 = vadd.xlane.f32.xlu1 %v1958_v50  ;;  %v4312_v55 = vpop.f32.mrf.mxu0  ;;  %v3682_v19 = vpop.eup %3681  ;;  %v1966_v23 = vmul.f32 %v3680_v11, %v4268_v63  ;;  %v1712_v39 = vadd.f32 %v3492_v53, %v4243_v40  ;;  %v1709_v30 = vadd.f32 %v4243_v40, %v4306_v47  ;;  %v1648_v47 = vadd.f32 %v4303_v43, %v4230_v29 }
 0x103   : > { %v4315_v59 = vpop.f32.mrf.mxu1  ;;  %v3684_v24 = vpop.eup %3683  ;;  %v1896_v31 = vmul.f32 %v3682_v19, %v4268_v63  ;;  %v1646_v43 = vadd.f32 %v4230_v29, %v4312_v55 }
 0x104   : > { %2143 = vadd.xlane.f32.xlu0 %v1955_v44  ;;  %v4324_v3 = vpop.f32.mrf.mxu0  ;;  %v3686_v33 = vpop.eup %3685  ;;  %v1900_v5 = vmul.f32 %v3684_v24, %v4268_v63  ;;  %3705 = vtanh.f32 %v1712_v39  ;;  %v1710_v29 = vadd.f32 %v4243_v40, %v4315_v59 }
 0x105   : > { %v4320_v2 = vpop.f32.mrf.mxu1  ;;  %v3688_v38 = vpop.eup %3687  ;;  %v1960_v46 = vmul.f32 %v3686_v33, %v4268_v63  ;;  %3707 = vtanh.f32 %v1644_v52 }
 0x106   : > { %2163 = vadd.xlane.f32.xlu1 %v1965_v61  ;;  %v4333_v16 = vpop.f32.mrf.mxu0  ;;  %v3690_v49 = vpop.eup %3689  ;;  %v1964_v54 = vmul.f32 %v3688_v38, %v4268_v63 }
 0x107   : > { %v1352_v7 = vpop.f32.mrf.mxu1  ;;  %v3692_v53 = vpop.eup %3691  ;;  %v1901_v61 = vmul.f32 %v3690_v49, %v4268_v63 }
 0x108   : > { %2145 = vadd.xlane.f32.xlu0 %v1956_v56  ;;  %v4342_v28 = vpop.f32.mrf.mxu0  ;;  %v1713_v57 = vadd.f32 %v4358_v20, %v1352_v7  ;;  %v3694_v32 = vpop.eup %3693  ;;  %v1905_v51 = vmul.f32 %v3692_v53, %v4268_v63 }
 0x109   : > { %v4329_v13 = vpop.f32.mrf.mxu1 }
 0x10a   : > { %2031 = vadd.xlane.f32.xlu1 %v1899_v9  ;;  %v4351_v44 = vpop.f32.mrf.mxu0  ;;  %3709 = vtanh.f32 %v1713_v57  ;;  %v1963_v9 = vmul.f32 %v3694_v32, %v4268_v63 }
 0x10b   : > { %v4336_v22 = vpop.f32.mrf.mxu1  ;;  %3711 = vtanh.f32 %v1708_v12 }
 0x10c   : > { %2147 = vadd.xlane.f32.xlu0 %v1957_v4  ;;  %v4366_v60 = vpop.f32.mrf.mxu0  ;;  %v3696_v4 = vpop.eup %3695 }
 0x10d   : > { %v3499_v25 = vpop.f32.mrf.mxu1  ;;  %v3698_v11 = vpop.eup %3697  ;;  %v1969_v19 = vmul.f32 %v3696_v4, %v4268_v63 }
 0x10e   : > { %2165 = vadd.xlane.f32.xlu1 %v1966_v23  ;;  %v1719_v7 = vadd.f32 %v3499_v25, %v4358_v20  ;;  %v1112_v1 = vpop.f32.mrf.mxu0  ;;  %v3700_v14 = vpop.eup %3699  ;;  %v1902_v58 = vmul.f32 %v3698_v11, %v4268_v63 }
 0x10f   : > { %v1368_v36 = vpop.f32.mrf.mxu1 }
 0x110   : > { %2157 = vadd.xlane.f32.xlu0 %v1962_v17  ;;  %v4382_v17 = vrot.slane %v4227_v27, %v4225_v18  ;;  %3713 = vtanh.f32 %v1719_v7  ;;  %v4390_v25 = vpop.f32.mrf.mxu0  ;;  %v3702_v18 = vpop.eup %3701 }
 0x111   : > { %v4348_v42 = vpop.f32.mrf.mxu1  ;;  %3715 = vtanh.f32 %v1642_v26  ;;  %v3704_v33 = vpop.eup %3703  ;;  %v1973_v39 = vmul.f32 %v3702_v18, %v4268_v63 }
 0x112   : > { %2033 = vadd.xlane.f32.xlu1 %v1900_v5  ;;  %v1653_v24 = vadd.f32 %v4382_v17, %v1112_v1  ;;  %v1717_v5 = vadd.f32 %v4358_v20, %v1368_v36  ;;  %v1115_v38 = vpop.f32.mrf.mxu0  ;;  %v1967_v52 = vmul.f32 %v3704_v33, %v4268_v63  ;;  %v1720_v36 = vadd.f32 %v4348_v42, %v4358_v20 }
 0x113   : > { %v4354_v50 = vpop.f32.mrf.mxu1  ;;  %v1654_v42 = vadd.f32 %v4382_v17, %v1115_v38  ;;  %v1651_v40 = vadd.f32 %v4324_v3, %v4382_v17  ;;  %v1715_v3 = vadd.f32 %v4320_v2, %v4358_v20  ;;  %v1649_v2 = vadd.f32 %v4382_v17, %v4333_v16 }
 0x114   : > { %2025 = vadd.xlane.f32.xlu0 %v1896_v31  ;;  %v1903_v31 = vmul.f32 %v3700_v14, %v4268_v63  ;;  %3717 = vtanh.f32 %v1653_v24  ;;  %v3439_v57 = vpop.f32.mrf.mxu0 }
 0x115   : > { %v4363_v56 = vpop.f32.mrf.mxu1  ;;  %3719 = vtanh.f32 %v1706_v15 }
 0x116   : > { %2161 = vadd.xlane.f32.xlu1 %v1964_v54  ;;  %3721 = vtanh.f32 %v1717_v5  ;;  %v1128_v1 = vpop.f32.mrf.mxu0 }
 0x117   : > { %v4369_v62 = vpop.f32.mrf.mxu1  ;;  %3723 = vtanh.f32 %v1647_v35 }
 0x118   : > { %2153 = vadd.xlane.f32.xlu0 %v1960_v46  ;;  %v3706_v46 = vpop.eup %3705  ;;  %3725 = vtanh.f32 %v1720_v36  ;;  %v4430_v18 = vpop.f32.mrf.mxu0 }
 0x119   : > { %v4374_v6 = vpop.f32.mrf.mxu1  ;;  %v3708_v54 = vpop.eup %3707  ;;  %3727 = vtanh.f32 %v1645_v21 }
 0x11a   : > { %2043 = vadd.xlane.f32.xlu1 %v1905_v51  ;;  %v3710_v32 = vpop.eup %3709  ;;  %v1906_v51 = vmul.f32 %v3708_v54, %v4268_v63  ;;  %3729 = vtanh.f32 %v1654_v42 }
 0x11b   : > { %v4378_v0 = vpop.f32.mrf.mxu1  ;;  %v3712_v4 = vpop.eup %3711  ;;  %3731 = vtanh.f32 %v1709_v30 }
 0x11c   : > { %2035 = vadd.xlane.f32.xlu0 %v1901_v61  ;;  %v1974_v61 = vmul.f32 %v3706_v46, %v4268_v63  ;;  %v4441_v46 = vpop.f32.mrf.mxu0 }
 0x11d   : > { %v4387_v23 = vpop.f32.mrf.mxu1  ;;  %v3714_v11 = vpop.eup %3713 }
 0x11e   : > { %2171 = vadd.xlane.f32.xlu1 %v1969_v19  ;;  %v1970_v19 = vmul.f32 %v3712_v4, %v4268_v63  ;;  %v3716_v14 = vpop.eup %3715  ;;  %v1981_v15 = vmul.f32 %v3714_v11, %v4268_v63  ;;  %v4453_v21 = vpop.f32.mrf.mxu0 }
 0x11f   : > { %v4393_v27 = vpop.f32.mrf.mxu1  ;;  %v1904_v5 = vmul.f32 %v3716_v14, %v4268_v63 }
 0x120   : > { %2159 = vadd.xlane.f32.xlu0 %v1963_v9  ;;  %v1975_v9 = vmul.f32 %v3710_v32, %v4268_v63  ;;  %v4464_v30 = vpop.f32.mrf.mxu0 }
 0x121   : > { %v4398_v37 = vpop.f32.mrf.mxu1 }
 0x122   : > { %2039 = vadd.xlane.f32.xlu1 %v1903_v31  ;;  %v3718_v31 = vpop.eup %3717 }
 0x123   : > { %v4402_v49 = vpop.f32.mrf.mxu1  ;;  %v3720_v38 = vpop.eup %3719  ;;  %v1915_v35 = vmul.f32 %v3718_v31, %v4268_v63 }
 0x124   : > { %2037 = vadd.xlane.f32.xlu0 %v1902_v58  ;;  %v1718_v58 = vadd.f32 %v4358_v20, %v4354_v50  ;;  %v1659_v50 = vadd.f32 %v3439_v57, %v4382_v17  ;;  %v1968_v36 = vmul.f32 %v3720_v38, %v4268_v63  ;;  %v1723_v57 = vadd.f32 %v4363_v56, %v4358_v20 }
 0x125   : > { %v4407_v53 = vpop.f32.mrf.mxu1  ;;  %v1657_v56 = vadd.f32 %v4382_v17, %v1128_v1  ;;  %v1721_v1 = vadd.f32 %v4358_v20, %v4369_v62  ;;  %v1660_v62 = vadd.f32 %v4430_v18, %v4382_v17  ;;  %v1724_v18 = vadd.f32 %v4374_v6, %v4358_v20 }
 0x126   : > { %2167 = vadd.xlane.f32.xlu1 %v1967_v52  ;;  %3733 = vtanh.f32 %v1718_v58  ;;  %v3722_v52 = vpop.eup %3721 }
 0x127   : > { %v4412_v12 = vpop.f32.mrf.mxu1  ;;  %3735 = vtanh.f32 %v1648_v47  ;;  %v4476_v47 = vpop.f32.mrf.mxu0 }
 0x128   : > { %2179 = vadd.xlane.f32.xlu0 %v1973_v39  ;;  %3737 = vtanh.f32 %v1659_v50 }
 0x129   : > { %v4417_v7 = vpop.f32.mrf.mxu1  ;;  %3739 = vtanh.f32 %v1646_v43 }
 0x12a   : > { %2045 = vadd.xlane.f32.xlu1 %v1906_v51  ;;  %v1979_v51 = vmul.f32 %v3722_v52, %v4268_v63  ;;  %3741 = vtanh.f32 %v1723_v57 }
 0x12b   : > { %v4421_v26 = vpop.f32.mrf.mxu1  ;;  %3743 = vtanh.f32 %v1710_v29 }
 0x12c   : > { %2181 = vadd.xlane.f32.xlu0 %v1974_v61  ;;  %v3724_v61 = vpop.eup %3723  ;;  %3745 = vtanh.f32 %v1657_v56 }
 0x12d   : > { %v4426_v24 = vpop.f32.mrf.mxu1  ;;  %v3726_v4 = vpop.eup %3725  ;;  %v1909_v55 = vmul.f32 %v3724_v61, %v4268_v63  ;;  %3747 = vtanh.f32 %v1651_v40  ;;  %v1658_v40 = vadd.f32 %v4382_v17, %v4441_v46 }
 0x12e   : > { %2173 = vadd.xlane.f32.xlu1 %v1970_v19  ;;  %v1982_v19 = vmul.f32 %v3726_v4, %v4268_v63  ;;  %3749 = vtanh.f32 %v1721_v1  ;;  %v1716_v1 = vadd.f32 %v4329_v13, %v4358_v20 }
 0x12f   : > { %v4433_v33 = vpop.f32.mrf.mxu1  ;;  %3751 = vtanh.f32 %v1715_v3 }
 0x130   : > { %2183 = vadd.xlane.f32.xlu0 %v1975_v9  ;;  %v3728_v9 = vpop.eup %3727  ;;  %3753 = vtanh.f32 %v1660_v62  ;;  %v1663_v62 = vadd.f32 %v4453_v21, %v4382_v17 }
 0x131   : > { %v4438_v39 = vpop.f32.mrf.mxu1  ;;  %v3730_v14 = vpop.eup %3729  ;;  %v1907_v59 = vmul.f32 %v3728_v9, %v4268_v63  ;;  %3755 = vtanh.f32 %v1649_v2  ;;  %v1714_v2 = vadd.f32 %v4358_v20, %v4336_v22 }
 0x132   : > { %2041 = vadd.xlane.f32.xlu1 %v1904_v5  ;;  %v1916_v5 = vmul.f32 %v3730_v14, %v4268_v63  ;;  %3757 = vtanh.f32 %v1724_v18 }
 0x133   : > { %v4444_v54 = vpop.f32.mrf.mxu1 }
 0x134   : > { %2195 = vadd.xlane.f32.xlu0 %v1981_v15  ;;  %v3732_v15 = vpop.eup %3731 }
 0x135   : > { %v4449_v32 = vpop.f32.mrf.mxu1  ;;  %v3734_v38 = vpop.eup %3733 }
 0x136   : > { %2169 = vadd.xlane.f32.xlu1 %v1968_v36  ;;  %v3736_v52 = vpop.eup %3735  ;;  %v4486_v36 = vpop.f32.mrf.mxu0  ;;  %v1980_v57 = vmul.f32 %v3734_v38, %v4268_v63  ;;  %v1722_v38 = vadd.f32 %v4358_v20, %v4378_v0 }
 0x137   : > { %v4456_v42 = vpop.f32.mrf.mxu1  ;;  %v1910_v4 = vmul.f32 %v3736_v52, %v4268_v63  ;;  %v1650_v52 = vadd.f32 %v4382_v17, %v4351_v44 }
 0x138   : > { %2063 = vadd.xlane.f32.xlu0 %v1915_v35  ;;  %v1971_v35 = vmul.f32 %v3732_v15, %v4268_v63 }
 0x139   : > { %v4461_v11 = vpop.f32.mrf.mxu1 }
 0x13a   : > { %2051 = vadd.xlane.f32.xlu1 %v1909_v55  ;;  %v4497_v55 = vpop.f32.mrf.mxu0 }
 0x13b   : > { %v4467_v58 = vpop.f32.mrf.mxu1 }
 0x13c   : > { %2191 = vadd.xlane.f32.xlu0 %v1979_v51  ;;  %v3738_v51 = vpop.eup %3737 }
 0x13d   : > { %v4472_v31 = vpop.f32.mrf.mxu1  ;;  %v3740_v29 = vpop.eup %3739  ;;  %v1921_v9 = vmul.f32 %v3738_v51, %v4268_v63 }
 0x13e   : > { %2047 = vadd.xlane.f32.xlu1 %v1907_v59  ;;  %v3742_v56 = vpop.eup %3741  ;;  %v1908_v16 = vmul.f32 %v3740_v29, %v4268_v63  ;;  %v4505_v59 = vpop.f32.mrf.mxu0  ;;  %v1661_v29 = vadd.f32 %v4382_v17, %v4464_v30 }
 0x13f   : > { %v4479_v50 = vpop.f32.mrf.mxu1  ;;  %v3744_v14 = vpop.eup %3743  ;;  %v1985_v6 = vmul.f32 %v3742_v56, %v4268_v63  ;;  %v1655_v56 = vadd.f32 %v4366_v60, %v4382_v17 }
 0x140   : > { %2197 = vadd.xlane.f32.xlu0 %v1982_v19  ;;  %v1652_v19 = vadd.f32 %v4342_v28, %v4382_v17  ;;  %v3746_v15 = vpop.eup %3745  ;;  %v1972_v28 = vmul.f32 %v3744_v14, %v4268_v63  ;;  %v4513_v3 = vpop.f32.mrf.mxu0 }
 0x141   : > { %v3524_v43 = vpop.f32.mrf.mxu1  ;;  %v1919_v46 = vmul.f32 %v3746_v15, %v4268_v63 }
 0x142   : > { %v4489_v61 = vadd.f32 %v3524_v43, %v4246_v41  ;;  %2175 = vadd.xlane.f32.xlu1 %v1971_v35  ;;  %3759 = vtanh.f32 %v1652_v19 }
 0x143   : > { %3761 = vtanh.f32 %v1658_v40 }
 0x144   : > { %2065 = vadd.xlane.f32.xlu0 %v1916_v5  ;;  %v3748_v5 = vpop.eup %3747  ;;  %3763 = vtanh.f32 %v1716_v1  ;;  %v1664_v1 = vadd.f32 %v4476_v47, %v4382_v17 }
 0x145   : > { %v3750_v35 = vpop.eup %3749  ;;  %v1913_v13 = vmul.f32 %v3748_v5, %v4268_v63  ;;  %3765 = vtanh.f32 %v1722_v38  ;;  %v1727_v38 = vadd.f32 %v4387_v23, %v4358_v20 }
 0x146   : > { %2053 = vadd.xlane.f32.xlu1 %v1910_v4  ;;  %v3752_v43 = vpop.eup %3751  ;;  %v1983_v0 = vmul.f32 %v3750_v35, %v4268_v63  ;;  %3767 = vtanh.f32 %v1650_v52  ;;  %v1728_v35 = vadd.f32 %v4398_v37, %v4358_v20 }
 0x147   : > { %v3754_v51 = vpop.eup %3753  ;;  %v1977_v44 = vmul.f32 %v3752_v43, %v4268_v63  ;;  %3769 = vtanh.f32 %v1663_v62  ;;  %v1726_v43 = vadd.f32 %v4358_v20, %v4402_v49 }
 0x148   : > { %2193 = vadd.xlane.f32.xlu0 %v1980_v57  ;;  %v4521_v57 = vpop.f32.mrf.mxu0  ;;  %v3756_v4 = vpop.eup %3755  ;;  %v1922_v21 = vmul.f32 %v3754_v51, %v4268_v63  ;;  %3771 = vtanh.f32 %v1714_v2 }
 0x149   : > { %v1911_v22 = vmul.f32 %v3756_v4, %v4268_v63  ;;  %3773 = vtanh.f32 %v1661_v29  ;;  %v1667_v4 = vadd.f32 %v4497_v55, %v4235_v34 }
 0x14a   : > { %2049 = vadd.xlane.f32.xlu1 %v1908_v16  ;;  %v4529_v18 = vpop.f32.mrf.mxu0  ;;  %v1725_v16 = vadd.f32 %v4358_v20, %v4393_v27  ;;  %3775 = vtanh.f32 %v1655_v56  ;;  %v1731_v56 = vadd.f32 %v4407_v53, %v4246_v41 }
 0x14c   : > { %2075 = vadd.xlane.f32.xlu0 %v1921_v9  ;;  %v3758_v9 = vpop.eup %3757  ;;  %v4537_v14 = vpop.f32.mrf.mxu0  ;;  %3777 = vtanh.f32 %v1725_v16  ;;  %v1666_v16 = vadd.f32 %v4235_v34, %v4521_v57 }
 0x14d   : > { %v1986_v30 = vmul.f32 %v3758_v9, %v4268_v63 }
 0x14e   : > { %2177 = vadd.xlane.f32.xlu1 %v1972_v28  ;;  %v4545_v28 = vpop.f32.mrf.mxu0 }
 0x14f   : > { %v3760_v19 = vpop.eup %3759 }
 0x150   : > { %2203 = vadd.xlane.f32.xlu0 %v1985_v6  ;;  %v3762_v40 = vpop.eup %3761  ;;  %v1656_v6 = vadd.f32 %v4390_v25, %v4382_v17  ;;  %v1914_v60 = vmul.f32 %v3760_v19, %v4268_v63  ;;  %v4553_v52 = vpop.f32.mrf.mxu0 }
 0x151   : > { %v3764_v15 = vpop.eup %3763  ;;  %v1920_v27 = vmul.f32 %v3762_v40, %v4268_v63  ;;  %v1665_v40 = vadd.f32 %v4235_v34, %v4505_v59 }
 0x152   : > { %2059 = vadd.xlane.f32.xlu1 %v1913_v13  ;;  %v3766_v5 = vpop.eup %3765  ;;  %3779 = vtanh.f32 %v1656_v6  ;;  %v1978_v25 = vmul.f32 %v3764_v15, %v4268_v63  ;;  %v4561_v51 = vpop.f32.mrf.mxu0  ;;  %v1730_v15 = vadd.f32 %v4246_v41, %v4421_v26 }
 0x153   : > { %3781 = vtanh.f32 %v1664_v1  ;;  %v1984_v47 = vmul.f32 %v3766_v5, %v4268_v63 }
 0x154   : > { %2071 = vadd.xlane.f32.xlu0 %v1919_v46  ;;  %v3768_v46 = vpop.eup %3767  ;;  %3783 = vtanh.f32 %v1727_v38  ;;  %v4569_v29 = vpop.f32.mrf.mxu0 }
 0x155   : > { %v3770_v13 = vpop.eup %3769  ;;  %v1912_v23 = vmul.f32 %v3768_v46, %v4268_v63  ;;  %3785 = vtanh.f32 %v1728_v35  ;;  %v1671_v35 = vadd.f32 %v4529_v18, %v4235_v34  ;;  %v1670_v18 = vadd.f32 %v4235_v34, %v4553_v52 }
 0x156   : > { %2187 = vadd.xlane.f32.xlu1 %v1977_v44  ;;  %v3772_v62 = vpop.eup %3771  ;;  %v1925_v37 = vmul.f32 %v3770_v13, %v4268_v63  ;;  %3787 = vtanh.f32 %v1726_v43  ;;  %v1668_v44 = vadd.f32 %v4513_v3, %v4235_v34  ;;  %v1669_v43 = vadd.f32 %v4235_v34, %v4537_v14 }
 0x157   : > { %v3774_v2 = vpop.eup %3773  ;;  %v1976_v20 = vmul.f32 %v3772_v62, %v4268_v63  ;;  %v1733_v14 = vadd.f32 %v4246_v41, %v4433_v33  ;;  %v1741_v52 = vadd.f32 %v4246_v41, %v4479_v50  ;;  %v1672_v33 = vadd.f32 %v4545_v28, %v4235_v34 }
 0x158   : > { %2199 = vadd.xlane.f32.xlu0 %v1983_v0  ;;  %v1662_v0 = vadd.f32 %v4382_v17, %v4486_v36  ;;  %v3776_v49 = vpop.eup %3775  ;;  %v1923_v17 = vmul.f32 %v3774_v2, %v4268_v63  ;;  %v1736_v28 = vadd.f32 %v4438_v39, %v4246_v41  ;;  %v1734_v39 = vadd.f32 %v4246_v41, %v4444_v54 }
 0x159   : > { %v3778_v36 = vpop.eup %3777  ;;  %v1917_v3 = vmul.f32 %v3776_v49, %v4268_v63 }
 0x15a   : > { %2055 = vadd.xlane.f32.xlu1 %v1911_v22  ;;  %3789 = vtanh.f32 %v1662_v0  ;;  %v4577_v22 = vpop.f32.mrf.mxu0  ;;  %v1987_v55 = vmul.f32 %v3778_v36, %v4268_v63 }
 0x15b   : > { %3791 = vtanh.f32 %v1668_v44 }
 0x15c   : > { %2077 = vadd.xlane.f32.xlu0 %v1922_v21  ;;  %v1732_v21 = vadd.f32 %v4417_v7, %v4246_v41  ;;  %3793 = vtanh.f32 %v1667_v4  ;;  %v4585_v6 = vpop.f32.mrf.mxu0 }
 0x15e   : > { %2061 = vadd.xlane.f32.xlu1 %v1914_v60  ;;  %3795 = vtanh.f32 %v1732_v21  ;;  %v4593_v5 = vpop.f32.mrf.mxu0  ;;  %v1467_v21 = vpop.f32.mrf.mxu1 }
 0x15f   : > { %v3780_v9 = vpop.eup %3779  ;;  %3797 = vtanh.f32 %v1731_v56  ;;  %v1742_v50 = vadd.f32 %v4246_v41, %v1467_v21 }
 0x160   : > { %2205 = vadd.xlane.f32.xlu0 %v1986_v30  ;;  %v3782_v19 = vpop.eup %3781  ;;  %v1918_v7 = vmul.f32 %v3780_v9, %v4268_v63  ;;  %3799 = vtanh.f32 %v1666_v16 }
 0x161   : > { %v3784_v30 = vpop.eup %3783  ;;  %v1926_v53 = vmul.f32 %v3782_v19, %v4268_v63  ;;  %3801 = vtanh.f32 %v1665_v40 }
 0x162   : > { %2189 = vadd.xlane.f32.xlu1 %v1978_v25  ;;  %v3786_v60 = vpop.eup %3785  ;;  %v1989_v57 = vmul.f32 %v3784_v30, %v4268_v63  ;;  %3803 = vtanh.f32 %v1730_v15  ;;  %v1735_v25 = vadd.f32 %v4426_v24, %v4246_v41 }
 0x163   : > { %v3788_v1 = vpop.eup %3787  ;;  %v1990_v59 = vmul.f32 %v3786_v60, %v4268_v63 }
 0x164   : > { %2073 = vadd.xlane.f32.xlu0 %v1920_v27  ;;  %v1729_v27 = vadd.f32 %v4246_v41, %v4412_v12  ;;  %v1988_v26 = vmul.f32 %v3788_v1, %v4268_v63 }
 0x166   : > { %2057 = vadd.xlane.f32.xlu1 %v1912_v23  ;;  %3805 = vtanh.f32 %v1729_v27 }
 0x167   : > { %v3790_v38 = vpop.eup %3789  ;;  %3807 = vtanh.f32 %v1735_v25 }
 0x168   : > { %2201 = vadd.xlane.f32.xlu0 %v1984_v47  ;;  %v3792_v46 = vpop.eup %3791  ;;  %v4601_v47 = vpop.f32.mrf.mxu0  ;;  %v1924_v12 = vmul.f32 %v3790_v38, %v4268_v63  ;;  %3809 = vtanh.f32 %v1671_v35 }
 0x169   : > { %v3794_v13 = vpop.eup %3793  ;;  %v1930_v24 = vmul.f32 %v3792_v46, %v4268_v63  ;;  %3811 = vtanh.f32 %v1669_v43  ;;  %v4650_v46 = vand.u32 127, %v1548_v8 }
 0x16a   : > { %2185 = vadd.xlane.f32.xlu1 %v1976_v20  ;;  %v4611_v0 = vpop.f32.mrf.mxu0  ;;  %3813 = vtanh.f32 %v1670_v18  ;;  %v1675_v18 = vadd.f32 %v4561_v51, %v4235_v34 }
 0x16b   : > { %v3796_v62 = vpop.eup %3795  ;;  %3815 = vtanh.f32 %v1733_v14  ;;  %v2428_v51 = vadd.s32 4294967272, %v4650_v46  ;;  %v2449_v21 = vadd.s32 4294967248, %v4650_v46 }
 0x16c   : > { %2083 = vadd.xlane.f32.xlu0 %v1925_v37  ;;  %v1929_v37 = vmul.f32 %v3794_v13, %v4268_v63  ;;  %v3798_v2 = vpop.eup %3797  ;;  %v1994_v44 = vmul.f32 %v3796_v62, %v4268_v63  ;;  %v4621_v4 = vpop.f32.mrf.mxu0  ;;  %3817 = vtanh.f32 %v1741_v52  ;;  %v2414_v52 = vadd.s32 4294967288, %v4650_v46 }
 0x16d   : > { %v3800_v49 = vpop.eup %3799  ;;  %3819 = vtanh.f32 %v1672_v33  ;;  %v2435_v33 = vadd.s32 4294967264, %v4650_v46 }
 0x16e   : > { %2067 = vadd.xlane.f32.xlu1 %v1917_v3  ;;  %v3802_v36 = vpop.eup %3801  ;;  %v1928_v9 = vmul.f32 %v3800_v49, %v4268_v63  ;;  %v3463_v19 = vpop.f32.mrf.mxu0  ;;  %3821 = vtanh.f32 %v1742_v50 }
 0x16f   : > { %v3804_v56 = vpop.eup %3803  ;;  %v1927_v16 = vmul.f32 %v3802_v36, %v4268_v63  ;;  %v1683_v60 = vadd.f32 %v3463_v19, %v4253_v48  ;;  %3823 = vtanh.f32 %v1736_v28  ;;  %v2442_v19 = vadd.s32 4294967256, %v4650_v46 }
 0x170   : > { %2079 = vadd.xlane.f32.xlu0 %v1923_v17  ;;  %v1993_v17 = vmul.f32 %v3798_v2, %v4268_v63  ;;  %v1992_v40 = vmul.f32 %v3804_v56, %v4268_v63  ;;  %v2421_v2 = vadd.s32 4294967280, %v4650_v46  ;;  %v1739_v56 = vadd.f32 %v4449_v32, %v4246_v41 }
 0x171   : > { %3825 = vtanh.f32 %v1683_v60  ;;  %v4688_v28 = vsub.s32 %v4650_v46, %v4218_v10 }
 0x172   : > { %2069 = vadd.xlane.f32.xlu1 %v1918_v7  ;;  %3827 = vtanh.f32 %v1734_v39  ;;  %v4700_v39 = vsub.s32 %v2428_v51, %v4218_v10 }
 0x173   : > { %v3806_v7 = vpop.eup %3805 }
 0x174   : > { %2207 = vadd.xlane.f32.xlu0 %v1987_v55  ;;  %v1991_v1 = vmul.f32 %v3806_v7, %v4268_v63  ;;  %v4684_v7 = vsub.s32 %v2421_v2, %v4218_v10 }
 0x176   : > { %2211 = vadd.xlane.f32.xlu1 %v1989_v57  ;;  %v4641_v57 = vpop.f32.mrf.mxu0 }
 0x178   : > { %2085 = vadd.xlane.f32.xlu0 %v1926_v53  ;;  %v3808_v53 = vpop.eup %3807  ;;  %v3464_v13 = vpop.f32.mrf.mxu0 }
 0x179   : > { %v3810_v27 = vpop.eup %3809  ;;  %v1997_v25 = vmul.f32 %v3808_v53, %v4268_v63 }
 0x17a   : > { %2209 = vadd.xlane.f32.xlu1 %v1988_v26  ;;  %v3812_v26 = vpop.eup %3811  ;;  %v1933_v43 = vmul.f32 %v3810_v27, %v4268_v63  ;;  %v1227_v53 = vpop.f32.mrf.mxu0 }
 0x17b   : > { %v1931_v8 = vmul.f32 %v3812_v26, %v4268_v63  ;;  %v4706_v26 = vsub.s32 %v2435_v33, %v4218_v10 }
 0x17c   : > { %2213 = vadd.xlane.f32.xlu0 %v1990_v59  ;;  %v3527_v59 = vpop.f32.mrf.mxu1 }
 0x17e   : > { %2093 = vadd.xlane.f32.xlu1 %v1930_v24  ;;  %v3814_v24 = vpop.eup %3813  ;;  %v4656_v62 = vpop.f32.mrf.mxu1 }
 0x17f   : > { %v1932_v49 = vmul.f32 %v3814_v24, %v4268_v63  ;;  %v4679_v63 = vld [vmem:[%s5284_s5] ss:$0 sm:$0xff]  ;;  %v1682_v24 = vadd.f32 %v4253_v48, %v1227_v53 }
 0x180   : > { %2081 = vadd.xlane.f32.xlu0 %v1924_v12  ;;  %v1747_v12 = vadd.f32 %v3527_v59, %v4250_v45  ;;  %v3528_v36 = vpop.f32.mrf.mxu1  ;;  %v1673_v59 = vadd.f32 %v4235_v34, %v4569_v29 }
 0x181   : > { %v4607_v23 = vpop.xlane.xlu0 %2027  ;;  %v1748_v32 = vadd.f32 %v3528_v36, %v4250_v45 }
 0x182   : > { %2221 = vadd.xlane.f32.xlu1 %v1994_v44  ;;  %3829 = vtanh.f32 %v1747_v12  ;;  %v1684_v44 = vadd.f32 %v3464_v13, %v4253_v48 }
 0x183   : > { %v4624_v3 = vpop.xlane.xlu1 %2155  ;;  %3831 = vtanh.f32 %v1675_v18  ;;  %v1483_v18 = vpop.f32.mrf.mxu1 }
 0x184   : > { %2091 = vadd.xlane.f32.xlu0 %v1929_v37  ;;  %v3816_v37 = vpop.eup %3815  ;;  %3833 = vtanh.f32 %v1684_v44  ;;  %v1746_v51 = vadd.f32 %v4250_v45, %v1483_v18 }
 0x185   : > { %v4617_v20 = vpop.xlane.xlu0 %2023  ;;  %v1995_v50 = vmul.f32 %v4679_v63, %v3816_v37  ;;  %3835 = vtanh.f32 %v1739_v56 }
 0x186   : > { %2089 = vadd.xlane.f32.xlu1 %v1928_v9  ;;  %3837 = vtanh.f32 %v1748_v32  ;;  %v2413_v2 = vrot.slane %v4617_v20, %v4688_v28 }
 0x187   : > { %v4633_v30 = vpop.xlane.xlu1 %2151  ;;  %3839 = vtanh.f32 %v1673_v59  ;;  %v2768_v59 = vrot.slane %v4624_v3, %v4684_v7 }
 0x188   : > { %2219 = vadd.xlane.f32.xlu0 %v1993_v17  ;;  %v3818_v17 = vpop.eup %3817  ;;  %3841 = vtanh.f32 %v1682_v24  ;;  %v2759_v32 = vrot.slane %v4633_v30, %v4688_v28 }
 0x189   : > { %v4629_v55 = vpop.xlane.xlu0 %2029  ;;  %v2003_v60 = vmul.f32 %v4679_v63, %v3818_v17  ;;  %v2425_v17 = vrot.slane %v4607_v23, %v4684_v7 }
 0x18a   : > { %2217 = vadd.xlane.f32.xlu1 %v1992_v40 }
 0x18b   : > { %v4644_v38 = vpop.xlane.xlu1 %2149 }
 0x18c   : > { %2087 = vadd.xlane.f32.xlu0 %v1927_v16  ;;  %v3820_v16 = vpop.eup %3819 }
 0x18d   : > { %v4639_v15 = vpop.xlane.xlu0 %2143  ;;  %v3822_v27 = vpop.eup %3821  ;;  %v1934_v13 = vmul.f32 %v4679_v63, %v3820_v16 }
 0x18e   : > { %2227 = vadd.xlane.f32.xlu1 %v1997_v25  ;;  %v4703_v25 = vsub.s32 %v2449_v21, %v4218_v10  ;;  %v3824_v29 = vpop.eup %3823  ;;  %v2432_v21 = vrot.slane %v4629_v55, %v4700_v39  ;;  %v3467_v16 = vpop.f32.mrf.mxu0 }
 0x18f   : > { %v4658_v54 = vpop.xlane.xlu1 %2163  ;;  %v3826_v37 = vpop.eup %3825  ;;  %v1998_v33 = vmul.f32 %v4679_v63, %v3824_v29 }
 0x190   : > { %2215 = vadd.xlane.f32.xlu0 %v1991_v1  ;;  %v4695_v1 = vsub.s32 %v2414_v52, %v4218_v10  ;;  %v1737_v52 = vadd.f32 %v4246_v41, %v4456_v42  ;;  %v3828_v56 = vpop.eup %3827 }
 0x191   : > { %v4652_v35 = vpop.xlane.xlu0 %2145  ;;  %v1996_v18 = vmul.f32 %v4679_v63, %v3828_v56 }
 0x192   : > { %2095 = vadd.xlane.f32.xlu1 %v1931_v8  ;;  %3843 = vtanh.f32 %v1737_v52 }
 0x193   : > { %v4672_v9 = vpop.xlane.xlu1 %2031  ;;  %3845 = vtanh.f32 %v1746_v51 }
 0x194   : > { %2099 = vadd.xlane.f32.xlu0 %v1933_v43  ;;  %v4712_v43 = vsub.s32 %v2442_v19, %v4218_v10  ;;  %v2439_v42 = vrot.slane %v4672_v9, %v4706_v26  ;;  %v1945_v19 = vmul.f32 %v4679_v63, %v3826_v37  ;;  %v1676_v9 = vadd.f32 %v4577_v22, %v4235_v34 }
 0x195   : > { %v4664_v14 = vpop.xlane.xlu0 %2147  ;;  %v2456_v22 = vadd.s32 4294967240, %v4650_v46 }
 0x196   : > { %2223 = vadd.xlane.f32.xlu1 %v1995_v50  ;;  %3847 = vtanh.f32 %v1676_v9 }
 0x197   : > { %v4708_v12 = vpop.xlane.xlu1 %2165 }
 0x198   : > { %2097 = vadd.xlane.f32.xlu0 %v1932_v49  ;;  %v2004_v49 = vmul.f32 %v4679_v63, %v3822_v27  ;;  %v3830_v27 = vpop.eup %3829 }
 0x199   : > { %v4690_v40 = vpop.xlane.xlu0 %2157  ;;  %v3832_v37 = vpop.eup %3831  ;;  %v2009_v52 = vmul.f32 %v4679_v63, %v3830_v27 }
 0x19a   : > { %2101 = vadd.xlane.f32.xlu1 %v1934_v13  ;;  %v2773_v30 = vrot.slane %v4690_v40, %v4700_v39  ;;  %v1937_v51 = vmul.f32 %v4679_v63, %v3832_v37 }
 0x19b   : > { %v2034_v36 = vpop.xlane.xlu1 %2033 }
 0x19c   : > { %2239 = vadd.xlane.f32.xlu0 %v2003_v60  ;;  %v2446_v55 = vrot.slane %v2034_v36, %v4712_v43  ;;  %v3834_v36 = vpop.eup %3833 }
 0x19d   : > { %v2026_v8 = vpop.xlane.xlu0 %2025 }
 0x19e   : > { %v2418_v44 = vrot.slane %v2026_v8, %v4695_v1  ;;  %2229 = vadd.xlane.f32.xlu1 %v1998_v33  ;;  %v1740_v33 = vadd.f32 %v4461_v11, %v4246_v41 }
 0x19f   : > { %v2162_v13 = vpop.xlane.xlu1 %2161 }
 0x1a0   : > { %v2420_v20 = vsel %vm2419_vm2, %v2418_v44, %v2413_v2  ;;  %2241 = vadd.xlane.f32.xlu0 %v2004_v49  ;;  %v1687_v2 = vadd.f32 %v3467_v16, %v4253_v48  ;;  %v3531_v49 = vpop.f32.mrf.mxu1  ;;  %v2783_v27 = vrot.slane %v2162_v13, %v4712_v43 }
 0x1a1   : > { %v2427_v50 = vsel %vm2426_vm3, %v2425_v17, %v2420_v20  ;;  %v2154_v23 = vpop.xlane.xlu0 %2153  ;;  %v2463_v20 = vadd.s32 4294967232, %v4650_v46 }
 0x1a2   : > { %v2434_v53 = vsel %vm2433_vm4, %v2432_v21, %v2427_v50  ;;  %v2763_v60 = vrot.slane %v2154_v23, %v4695_v1  ;;  %2225 = vadd.xlane.f32.xlu1 %v1996_v18  ;;  %v4761_v50 = vsub.s32 %v2456_v22, %v4218_v10  ;;  %3849 = vtanh.f32 %v1687_v2  ;;  %v1496_v16 = vpop.f32.mrf.mxu1 }
 0x1a3   : > { %v2441_v29 = vsel %vm2440_vm5, %v2439_v42, %v2434_v53  ;;  %v4753_v21 = vpop.xlane.xlu1 %2043  ;;  %v3836_v42 = vpop.eup %3835  ;;  %v1674_v53 = vadd.f32 %v4235_v34, %v4585_v6  ;;  %3851 = vtanh.f32 %v1740_v33  ;;  %v1749_v6 = vadd.f32 %v4250_v45, %v1496_v16 }
 0x1a4   : > { %v2764_v24 = vsel %vm2419_vm2, %v2763_v60, %v2759_v32  ;;  %2123 = vadd.xlane.f32.xlu0 %v1945_v19  ;;  %v2448_v8 = vsel %vm2447_vm6, %v2446_v55, %v2441_v29  ;;  %v1751_v19 = vadd.f32 %v3531_v49, %v4250_v45  ;;  %v1946_v55 = vmul.f32 %v4679_v63, %v3834_v36  ;;  %v3838_v11 = vpop.eup %3837  ;;  %v4768_v60 = vpop.f32.mrf.mxu0 }
 0x1a5   : > { %v2769_v3 = vsel %vm2426_vm3, %v2768_v59, %v2764_v24  ;;  %v2036_v44 = vpop.xlane.xlu0 %2035  ;;  %v4774_v59 = vsub.s32 %v2463_v20, %v4218_v10  ;;  %v3840_v29 = vpop.eup %3839  ;;  %v2001_v18 = vmul.f32 %v4679_v63, %v3836_v42  ;;  %v2793_v13 = vrot.slane %v4708_v12, %v4761_v50 }
 0x1a6   : > { %v2453_v40 = vrot.slane %v2036_v44, %v4703_v25  ;;  %v2774_v17 = vsel %vm2433_vm4, %v2773_v30, %v2769_v3  ;;  %2107 = vadd.xlane.f32.xlu1 %v1937_v51  ;;  %v2788_v30 = vrot.slane %v4658_v54, %v4703_v25  ;;  %v3842_v2 = vpop.eup %3841  ;;  %3853 = vtanh.f32 %v1751_v19  ;;  %v3468_v49 = vpop.f32.mrf.mxu0 }
 0x1a7   : > { %v4771_v9 = vpop.xlane.xlu1 %2171  ;;  %v2010_v3 = vmul.f32 %v4679_v63, %v3838_v11  ;;  %v1738_v44 = vadd.f32 %v4246_v41, %v4467_v58  ;;  %3855 = vtanh.f32 %v1674_v53  ;;  %v1935_v20 = vmul.f32 %v4679_v63, %v3840_v29  ;;  %v3532_v19 = vpop.f32.mrf.mxu1 }
 0x1a8   : > { %v2455_v56 = vsel %vm2454_vm7, %v2453_v40, %v2448_v8  ;;  %2251 = vadd.xlane.f32.xlu0 %v2009_v52  ;;  %v3844_v52 = vpop.eup %3843  ;;  %3857 = vtanh.f32 %v1749_v6  ;;  %v1688_v51 = vadd.f32 %v3468_v49, %v4253_v48  ;;  %v1944_v58 = vmul.f32 %v4679_v63, %v3842_v2  ;;  %v4807_v29 = vpop.f32.mrf.mxu0 }
 0x1a9   : > { %v2160_v23 = vpop.xlane.xlu0 %2159  ;;  %3859 = vtanh.f32 %v1738_v44  ;;  %v2484_v49 = vadd.s32 4294967208, %v4650_v46 }
 0x1aa   : > { %v2778_v32 = vrot.slane %v2160_v23, %v4706_v26  ;;  %2235 = vadd.xlane.f32.xlu1 %v2001_v18  ;;  %v3846_v23 = vpop.eup %3845  ;;  %3861 = vtanh.f32 %v1688_v51  ;;  %v1499_v18 = vpop.f32.mrf.mxu1 }
 0x1ab   : > { %v2040_v40 = vpop.xlane.xlu1 %2039  ;;  %v3848_v11 = vpop.eup %3847 }
 0x1ac   : > { %v2779_v24 = vsel %vm2440_vm5, %v2778_v32, %v2774_v17  ;;  %2125 = vadd.xlane.f32.xlu0 %v1946_v55  ;;  %v2467_v17 = vrot.slane %v2040_v40, %v4774_v59  ;;  %v1999_v55 = vmul.f32 %v4679_v63, %v3844_v52  ;;  %v3471_v44 = vpop.f32.mrf.mxu0  ;;  %v1677_v52 = vadd.f32 %v4235_v34, %v4601_v47 }
 0x1ad   : > { %v2784_v8 = vsel %vm2447_vm6, %v2783_v27, %v2779_v24  ;;  %v2038_v37 = vpop.xlane.xlu0 %2037  ;;  %v1752_v27 = vadd.f32 %v3532_v19, %v4250_v45  ;;  %v2008_v24 = vmul.f32 %v4679_v63, %v3846_v23  ;;  %v1691_v23 = vadd.f32 %v3471_v44, %v4253_v48 }
 0x1ae   : > { %v2460_v22 = vrot.slane %v2038_v37, %v4761_v50  ;;  %v2789_v54 = vsel %vm2454_vm7, %v2788_v30, %v2784_v8  ;;  %2103 = vadd.xlane.f32.xlu1 %v1935_v20  ;;  %v1938_v8 = vmul.f32 %v4679_v63, %v3848_v11  ;;  %v2470_v37 = vadd.s32 4294967224, %v4650_v46 }
 0x1af   : > { %v2794_v12 = vsel %vm2461_vm8, %v2793_v13, %v2789_v54  ;;  %v2168_v16 = vpop.xlane.xlu1 %2167  ;;  %v1743_v13 = vadd.f32 %v4472_v31, %v4246_v41  ;;  %v3535_v31 = vpop.f32.mrf.mxu1  ;;  %v4840_v19 = vsub.s32 %v2484_v49, %v4218_v10 }
 0x1b0   : > { %v2462_v36 = vsel %vm2461_vm8, %v2460_v22, %v2455_v56  ;;  %2253 = vadd.xlane.f32.xlu0 %v2010_v3  ;;  %v1679_v56 = vadd.f32 %v4593_v5, %v4235_v34  ;;  %v2798_v32 = vrot.slane %v2168_v16, %v4774_v59  ;;  %v3850_v5 = vpop.eup %3849  ;;  %v2477_v22 = vadd.s32 4294967216, %v4650_v46 }
 0x1b1   : > { %v4793_v33 = vpop.xlane.xlu0 %2179  ;;  %v4798_v42 = vsel %vm2468_vm9, %v2467_v17, %v2462_v36  ;;  %v3852_v2 = vpop.eup %3851  ;;  %v1750_v3 = vadd.f32 %v4250_v45, %v1499_v18  ;;  %v1949_v40 = vmul.f32 %v4679_v63, %v3850_v5  ;;  %v4831_v36 = vsub.s32 %v2470_v37, %v4218_v10 }
 0x1b2   : > { %v4810_v30 = vsel %vm2468_vm9, %v2798_v32, %v2794_v12  ;;  %2231 = vadd.xlane.f32.xlu1 %v1999_v55  ;;  %3863 = vtanh.f32 %v1679_v56  ;;  %v2002_v17 = vmul.f32 %v4679_v63, %v3852_v2  ;;  %v4834_v51 = vsub.s32 %v2477_v22, %v4218_v10  ;;  %v1512_v32 = vpop.f32.mrf.mxu1 }
 0x1b3   : > { %v4813_v6 = vpop.xlane.xlu1 %2045  ;;  %3865 = vtanh.f32 %v1752_v27  ;;  %v3854_v41 = vpop.eup %3853  ;;  %v1680_v56 = vadd.f32 %v4611_v0, %v4235_v34  ;;  %v1755_v5 = vadd.f32 %v3535_v31, %v4250_v45 }
 0x1b4   : > { %2121 = vadd.xlane.f32.xlu0 %v1944_v58  ;;  %3867 = vtanh.f32 %v1743_v13  ;;  %v3856_v20 = vpop.eup %3855  ;;  %v2013_v47 = vmul.f32 %v4679_v63, %v3854_v41  ;;  %v2481_v18 = vrot.slane %v4753_v21, %v4834_v51  ;;  %v1256_v0 = vpop.f32.mrf.mxu0 }
 0x1b5   : > { %v4804_v53 = vpop.xlane.xlu0 %2181  ;;  %3869 = vtanh.f32 %v1750_v3  ;;  %v3858_v16 = vpop.eup %3857  ;;  %v1936_v27 = vmul.f32 %v4679_v63, %v3856_v20  ;;  %v1678_v3 = vadd.f32 %v4235_v34, %v4621_v4  ;;  %v1689_v31 = vadd.f32 %v4253_v48, %v1256_v0 }
 0x1b6   : > { %2109 = vadd.xlane.f32.xlu1 %v1938_v8  ;;  %3871 = vtanh.f32 %v1677_v52  ;;  %v2488_v8 = vrot.slane %v4813_v6, %v4840_v19  ;;  %v2011_v2 = vmul.f32 %v4679_v63, %v3858_v16  ;;  %v4859_v44 = vpop.f32.mrf.mxu1  ;;  %v2491_v52 = vadd.s32 4294967200, %v4650_v46 }
 0x1b7   : > { %v4825_v12 = vpop.xlane.xlu1 %2173  ;;  %3873 = vtanh.f32 %v1691_v23  ;;  %v2808_v34 = vrot.slane %v4771_v9, %v4834_v51  ;;  %v1681_v9 = vadd.f32 %v4253_v48, %v4641_v57 }
 0x1b8   : > { %2249 = vadd.xlane.f32.xlu0 %v2008_v24  ;;  %v3860_v24 = vpop.eup %3859  ;;  %3875 = vtanh.f32 %v1680_v56  ;;  %v1515_v16 = vpop.f32.mrf.mxu1 }
 0x1b9   : > { %v4820_v54 = vpop.xlane.xlu0 %2183  ;;  %v3862_v22 = vpop.eup %3861  ;;  %v2000_v6 = vmul.f32 %v4679_v63, %v3860_v24  ;;  %3877 = vtanh.f32 %v1755_v5  ;;  %v1753_v24 = vadd.f32 %v4250_v45, %v1512_v32 }
 0x1ba   : > { %2237 = vadd.xlane.f32.xlu1 %v2002_v17  ;;  %v2813_v17 = vrot.slane %v4825_v12, %v4840_v19  ;;  %v1950_v23 = vmul.f32 %v4679_v63, %v3862_v22  ;;  %3879 = vtanh.f32 %v1678_v3  ;;  %v3472_v5 = vpop.f32.mrf.mxu0  ;;  %v4890_v57 = vpop.f32.mrf.mxu1 }
 0x1bb   : > { %v2042_v55 = vpop.xlane.xlu1 %2041  ;;  %3881 = vtanh.f32 %v1689_v31 }
 0x1bc   : > { %2131 = vadd.xlane.f32.xlu0 %v1949_v40  ;;  %v2474_v11 = vrot.slane %v2042_v55, %v4831_v36  ;;  %3883 = vtanh.f32 %v1681_v9 }
 0x1bd   : > { %v4836_v58 = vpop.xlane.xlu0 %2195  ;;  %3885 = vtanh.f32 %v1753_v24  ;;  %v2512_v24 = vadd.s32 4294967176, %v4650_v46 }
 0x1be   : > { %v2476_v37 = vsel %vm2475_vm10, %v2474_v11, %v4798_v42  ;;  %2105 = vadd.xlane.f32.xlu1 %v1936_v27 }
 0x1bf   : > { %v2483_v21 = vsel %vm2482_vm11, %v2481_v18, %v2476_v37  ;;  %v2170_v49 = vpop.xlane.xlu1 %2169  ;;  %v3864_v41 = vpop.eup %3863  ;;  %v4887_v18 = vsub.s32 %v2491_v52, %v4218_v10 }
 0x1c0   : > { %2259 = vadd.xlane.f32.xlu0 %v2013_v47  ;;  %v2803_v40 = vrot.slane %v2170_v49, %v4831_v36  ;;  %v2490_v42 = vsel %vm2489_vm12, %v2488_v8, %v2483_v21  ;;  %v3866_v47 = vpop.eup %3865  ;;  %v1941_v11 = vmul.f32 %v4679_v63, %v3864_v41  ;;  %v1692_v49 = vadd.f32 %v3472_v5, %v4253_v48  ;;  %v4901_v52 = vpop.f32.mrf.mxu1 }
 0x1c1   : > { %v4850_v13 = vpop.xlane.xlu0 %2063  ;;  %v3868_v27 = vpop.eup %3867  ;;  %v2014_v0 = vmul.f32 %v4679_v63, %v3866_v47  ;;  %v2498_v47 = vadd.s32 4294967192, %v4650_v46  ;;  %v2505_v5 = vadd.s32 4294967184, %v4650_v46 }
 0x1c2   : > { %v2804_v20 = vsel %vm2475_vm10, %v2803_v40, %v4810_v30  ;;  %2233 = vadd.xlane.f32.xlu1 %v2000_v6  ;;  %v3870_v8 = vpop.eup %3869  ;;  %v2005_v32 = vmul.f32 %v4679_v63, %v3868_v27  ;;  %v1259_v40 = vpop.f32.mrf.mxu0 }
 0x1c3   : > { %v2809_v56 = vsel %vm2482_vm11, %v2808_v34, %v2804_v20  ;;  %v4877_v55 = vpop.xlane.xlu1 %2051  ;;  %v3872_v3 = vpop.eup %3871  ;;  %v2012_v41 = vmul.f32 %v4679_v63, %v3870_v8  ;;  %v1685_v34 = vadd.f32 %v4253_v48, %v4768_v60  ;;  %v1686_v8 = vadd.f32 %v4253_v48, %v4807_v29 }
 0x1c4   : > { %2255 = vadd.xlane.f32.xlu0 %v2011_v2  ;;  %v2814_v12 = vsel %vm2489_vm12, %v2813_v17, %v2809_v56  ;;  %v1745_v2 = vadd.f32 %v4250_v45, %v4656_v62  ;;  %v3874_v31 = vpop.eup %3873  ;;  %v1939_v20 = vmul.f32 %v4679_v63, %v3872_v3  ;;  %v1690_v56 = vadd.f32 %v4253_v48, %v1259_v40  ;;  %v4913_v60 = vpop.f32.mrf.mxu1 }
 0x1c5   : > { %v4869_v4 = vpop.xlane.xlu0 %2191  ;;  %v4931_v48 = vsub.s32 %v2505_v5, %v4218_v10 }
 0x1c6   : > { %2115 = vadd.xlane.f32.xlu1 %v1941_v11  ;;  %3887 = vtanh.f32 %v1745_v2  ;;  %v1953_v11 = vmul.f32 %v4679_v63, %v3874_v31  ;;  %v1531_v40 = vpop.f32.mrf.mxu1 }
 0x1c7   : > { %v2048_v37 = vpop.xlane.xlu1 %2047  ;;  %3889 = vtanh.f32 %v1692_v49 }
 0x1c8   : > { %2133 = vadd.xlane.f32.xlu0 %v1950_v23  ;;  %v2495_v22 = vrot.slane %v2048_v37, %v4887_v18  ;;  %v3876_v23 = vpop.eup %3875  ;;  %3891 = vtanh.f32 %v1685_v34  ;;  %v2509_v34 = vrot.slane %v4877_v55, %v4931_v48  ;;  %v1756_v55 = vadd.f32 %v4859_v44, %v4250_v45 }
 0x1c9   : > { %v4883_v30 = vpop.xlane.xlu0 %2197  ;;  %v3878_v27 = vpop.eup %3877  ;;  %v1942_v37 = vmul.f32 %v4679_v63, %v3876_v23  ;;  %3893 = vtanh.f32 %v1690_v56 }
 0x1ca   : > { %v2497_v6 = vsel %vm2496_vm13, %v2495_v22, %v2490_v42  ;;  %2243 = vadd.xlane.f32.xlu1 %v2005_v32  ;;  %v3880_v2 = vpop.eup %3879  ;;  %v4924_v32 = vsub.s32 %v2498_v47, %v4218_v10  ;;  %v2017_v3 = vmul.f32 %v4679_v63, %v3878_v27  ;;  %3895 = vtanh.f32 %v1686_v8 }
 0x1cb   : > { %v2176_v62 = vpop.xlane.xlu1 %2175  ;;  %v3882_v49 = vpop.eup %3881  ;;  %v1940_v31 = vmul.f32 %v4679_v63, %v3880_v2  ;;  %v1759_v8 = vadd.f32 %v4890_v57, %v4250_v45  ;;  %v1757_v57 = vadd.f32 %v4250_v45, %v4901_v52 }
 0x1cc   : > { %2261 = vadd.xlane.f32.xlu0 %v2014_v0  ;;  %v2818_v17 = vrot.slane %v2176_v62, %v4887_v18  ;;  %v3884_v62 = vpop.eup %3883  ;;  %v1951_v47 = vmul.f32 %v4679_v63, %v3882_v49 }
 0x1cd   : > { %v4896_v21 = vpop.xlane.xlu0 %2065  ;;  %v3886_v56 = vpop.eup %3885 }
 0x1ce   : > { %v2819_v9 = vsel %vm2496_vm13, %v2818_v17, %v2814_v12  ;;  %2111 = vadd.xlane.f32.xlu1 %v1939_v20  ;;  %v1754_v12 = vadd.f32 %v4250_v45, %v1515_v16 }
 0x1cf   : > { %v2054_v0 = vpop.xlane.xlu1 %2053 }
 0x1d0   : > { %2257 = vadd.xlane.f32.xlu0 %v2012_v41  ;;  %v4928_v41 = vsub.s32 %v2512_v24, %v4218_v10  ;;  %3897 = vtanh.f32 %v1754_v12  ;;  %v1758_v10 = vadd.f32 %v4250_v45, %v1531_v40  ;;  %v2015_v12 = vmul.f32 %v4679_v63, %v3886_v56 }
 0x1d1   : > { %v4908_v42 = vpop.xlane.xlu0 %2193  ;;  %3899 = vtanh.f32 %v4489_v61  ;;  %v2828_v61 = vrot.slane %v4793_v33, %v4931_v48 }
 0x1d2   : > { %2117 = vadd.xlane.f32.xlu1 %v1942_v37  ;;  %v2516_v20 = vrot.slane %v2054_v0, %v4928_v41  ;;  %v1943_v0 = vmul.f32 %v4679_v63, %v3884_v62  ;;  %3901 = vtanh.f32 %v1758_v10  ;;  %v2833_v44 = vrot.slane %v4804_v53, %v4928_v41 }
 0x1d3   : > { %v2050_v29 = vpop.xlane.xlu1 %2049  ;;  %3903 = vtanh.f32 %v1756_v55  ;;  %v1760_v62 = vadd.f32 %v4913_v60, %v4250_v45 }
 0x1d4   : > { %2139 = vadd.xlane.f32.xlu0 %v1953_v11  ;;  %v2502_v16 = vrot.slane %v2050_v29, %v4924_v32  ;;  %3905 = vtanh.f32 %v1759_v8 }
 0x1d5   : > { %v4921_v22 = vpop.xlane.xlu0 %2075  ;;  %3907 = vtanh.f32 %v1757_v57 }
 0x1d6   : > { %v2504_v23 = vsel %vm2503_vm14, %v2502_v16, %v2497_v6  ;;  %2113 = vadd.xlane.f32.xlu1 %v1940_v31  ;;  %v3888_v6 = vpop.eup %3887  ;;  %3909 = vtanh.f32 %v1760_v62 }
 0x1d7   : > { %v2511_v11 = vsel %vm2510_vm15, %v2509_v34, %v2504_v23  ;;  %v2178_v27 = vpop.xlane.xlu1 %2177  ;;  %v2007_v29 = vmul.f32 %v4679_v63, %v3888_v6 }
 0x1d8   : > { %2267 = vadd.xlane.f32.xlu0 %v2017_v3  ;;  %v4948_v24 = vsel %vm2517_vm0, %v2516_v20, %v2511_v11  ;;  %v2823_v5 = vrot.slane %v2178_v27, %v4924_v32  ;;  %v3890_v3 = vpop.eup %3889 }
 0x1d9   : > { %v4937_v17 = vpop.xlane.xlu0 %2203  ;;  %v3892_v53 = vpop.eup %3891 }
 0x1da   : > { %v2824_v2 = vsel %vm2503_vm14, %v2823_v5, %v2819_v9  ;;  %2119 = vadd.xlane.f32.xlu1 %v1943_v0  ;;  %v1954_v9 = vmul.f32 %v4679_v63, %v3890_v3  ;;  %v3894_v31 = vpop.eup %3893  ;;  %v1947_v52 = vmul.f32 %v4679_v63, %v3892_v53 }
 0x1db   : > { %v2829_v49 = vsel %vm2510_vm15, %v2828_v61, %v2824_v2  ;;  %v2060_v40 = vpop.xlane.xlu1 %2059  ;;  %v3896_v10 = vpop.eup %3895 }
 0x1dc   : > { %2135 = vadd.xlane.f32.xlu0 %v1951_v47  ;;  %v4966_v33 = vsel %vm2517_vm0, %v2833_v44, %v2829_v49  ;;  %v1952_v47 = vmul.f32 %v4679_v63, %v3894_v31  ;;  %v1948_v27 = vmul.f32 %v4679_v63, %v3896_v10 }
 0x1dd   : > { %v4956_v37 = vpop.xlane.xlu0 %2071  ;;  %v3898_v23 = vpop.eup %3897 }
 0x1de   : > { %2247 = vadd.xlane.f32.xlu1 %v2007_v29  ;;  %v3900_v11 = vpop.eup %3899  ;;  %v2016_v45 = vmul.f32 %v4679_v63, %v3898_v23 }
 0x1df   : > { %v2188_v34 = vpop.xlane.xlu1 %2187  ;;  %v3902_v60 = vpop.eup %3901  ;;  %v2006_v0 = vmul.f32 %v4679_v63, %v3900_v11  ;;  %v2541_v11 = vrot.slane %v4850_v13, %v4706_v26 }
 0x1e0   : > { %2263 = vadd.xlane.f32.xlu0 %v2015_v12  ;;  %v3904_v6 = vpop.eup %3903  ;;  %v2020_v61 = vmul.f32 %v4679_v63, %v3902_v60  ;;  %v2838_v60 = vrot.slane %v4820_v54, %v4688_v28  ;;  %v2857_v54 = vrot.slane %v4869_v4, %v4706_v26 }
 0x1e1   : > { %v4969_v16 = vpop.xlane.xlu0 %2199  ;;  %v3906_v44 = vpop.eup %3905  ;;  %v2018_v12 = vmul.f32 %v4679_v63, %v3904_v6  ;;  %v2847_v6 = vrot.slane %v2188_v34, %v4684_v7 }
 0x1e2   : > { %2127 = vadd.xlane.f32.xlu1 %v1947_v52  ;;  %v3908_v3 = vpop.eup %3907  ;;  %v2021_v57 = vmul.f32 %v4679_v63, %v3906_v44  ;;  %v2531_v52 = vrot.slane %v2060_v40, %v4684_v7  ;;  %v2546_v40 = vrot.slane %v4896_v21, %v4712_v43 }
 0x1e3   : > { %v2056_v56 = vpop.xlane.xlu1 %2055  ;;  %v3910_v53 = vpop.eup %3909  ;;  %v2019_v62 = vmul.f32 %v4679_v63, %v3908_v3 }
 0x1e4   : > { %2141 = vadd.xlane.f32.xlu0 %v1954_v9  ;;  %v2522_v9 = vrot.slane %v2056_v56, %v4688_v28 }
 0x1e5   : > { %v4975_v20 = vpop.xlane.xlu0 %2077 }
 0x1e6   : > { %2129 = vadd.xlane.f32.xlu1 %v1948_v27 }
 0x1e7   : > { %v2062_v5 = vpop.xlane.xlu1 %2061 }
 0x1e8   : > { %2137 = vadd.xlane.f32.xlu0 %v1952_v47  ;;  %v2536_v23 = vrot.slane %v2062_v5, %v4700_v39 }
 0x1e9   : > { %v4979_v55 = vpop.xlane.xlu0 %2205 }
 0x1ea   : > { %2245 = vadd.xlane.f32.xlu1 %v2006_v0 }
 0x1eb   : > { %v2190_v2 = vpop.xlane.xlu1 %2189 }
 0x1ec   : > { %2265 = vadd.xlane.f32.xlu0 %v2016_v45  ;;  %v2022_v45 = vmul.f32 %v4679_v63, %v3910_v53  ;;  %v2852_v44 = vrot.slane %v2190_v2, %v4700_v39  ;;  %v2867_v2 = vrot.slane %v4836_v58, %v4703_v25 }
 0x1ed   : > { %v4983_v8 = vpop.xlane.xlu0 %2073 }
 0x1ee   : > { %2269 = vadd.xlane.f32.xlu1 %v2018_v12 }
 0x1ef   : > { %v2058_v29 = vpop.xlane.xlu1 %2057 }
 0x1f0   : > { %2273 = vadd.xlane.f32.xlu0 %v2020_v61  ;;  %v2526_v31 = vrot.slane %v2058_v29, %v4695_v1 }
 0x1f1   : > { %v2202_v49 = vpop.xlane.xlu0 %2201 }
 0x1f2   : > { %v2527_v47 = vsel %vm2419_vm2, %v2526_v31, %v2522_v9  ;;  %2271 = vadd.xlane.f32.xlu1 %v2019_v62  ;;  %v2872_v31 = vrot.slane %v4883_v30, %v4761_v50  ;;  %v2561_v30 = vrot.slane %v4956_v37, %v4774_v59 }
 0x1f3   : > { %v2532_v27 = vsel %vm2426_vm3, %v2531_v52, %v2527_v47  ;;  %v2186_v56 = vpop.xlane.xlu1 %2185  ;;  %v2882_v47 = vrot.slane %v2202_v49, %v4831_v36  ;;  %v2566_v49 = vrot.slane %v4983_v8, %v4831_v36 }
 0x1f4   : > { %2275 = vadd.xlane.f32.xlu0 %v2021_v57  ;;  %v2537_v0 = vsel %vm2433_vm4, %v2536_v23, %v2532_v27  ;;  %v2842_v5 = vrot.slane %v2186_v56, %v4695_v1  ;;  %v2862_v57 = vrot.slane %v4908_v42, %v4712_v43  ;;  %v2877_v42 = vrot.slane %v4969_v16, %v4774_v59 }
 0x1f5   : > { %v4992_v10 = vpop.xlane.xlu0 %2083  ;;  %v2542_v61 = vsel %vm2440_vm5, %v2541_v11, %v2537_v0  ;;  %v2887_v27 = vrot.slane %v4937_v17, %v4834_v51  ;;  %v2571_v17 = vrot.slane %v4921_v22, %v4834_v51 }
 0x1f6   : > { %v2843_v12 = vsel %vm2419_vm2, %v2842_v5, %v2838_v60  ;;  %2277 = vadd.xlane.f32.xlu1 %v2022_v45  ;;  %v2547_v63 = vsel %vm2447_vm6, %v2546_v40, %v2542_v61  ;;  %v2892_v60 = vrot.slane %v4979_v55, %v4840_v19  ;;  %v2576_v61 = vrot.slane %v4975_v20, %v4840_v19 }
 0x1f7   : > { %v2848_v21 = vsel %vm2426_vm3, %v2847_v6, %v2843_v12  ;;  %v2068_v3 = vpop.xlane.xlu1 %2067 }
 0x1f8   : > { %v2853_v34 = vsel %vm2433_vm4, %v2852_v44, %v2848_v21  ;;  %v2551_v29 = vrot.slane %v2068_v3, %v4703_v25 }
 0x1f9   : > { %v2080_v13 = vpop.xlane.xlu0 %2079  ;;  %v2858_v53 = vsel %vm2440_vm5, %v2857_v54, %v2853_v34 }
 0x1fa   : > { %v2863_v4 = vsel %vm2447_vm6, %v2862_v57, %v2858_v53  ;;  %v2552_v62 = vsel %vm2454_vm7, %v2551_v29, %v2547_v63  ;;  %v2581_v8 = vrot.slane %v2080_v13, %v4887_v18  ;;  %v2591_v53 = vrot.slane %v4992_v10, %v4931_v48 }
 0x1fb   : > { %v2868_v52 = vsel %vm2454_vm7, %v2867_v2, %v2863_v4  ;;  %v2070_v23 = vpop.xlane.xlu1 %2069 }
 0x1fc   : > { %v2556_v58 = vrot.slane %v2070_v23, %v4761_v50  ;;  %v2873_v11 = vsel %vm2461_vm8, %v2872_v31, %v2868_v52 }
 0x1fd   : > { %v2208_v9 = vpop.xlane.xlu0 %2207  ;;  %v2878_v56 = vsel %vm2468_vm9, %v2877_v42, %v2873_v11 }
 0x1fe   : > { %v2897_v45 = vrot.slane %v2208_v9, %v4887_v18  ;;  %v2557_v40 = vsel %vm2461_vm8, %v2556_v58, %v2552_v62  ;;  %v2883_v0 = vsel %vm2475_vm10, %v2882_v47, %v2878_v56 }
 0x1ff   : > { %v2562_v37 = vsel %vm2468_vm9, %v2561_v30, %v2557_v40  ;;  %v2888_v5 = vsel %vm2482_vm11, %v2887_v27, %v2883_v0  ;;  %v2212_v6 = vpop.xlane.xlu1 %2211 }
 0x200   : > { %v2567_v55 = vsel %vm2475_vm10, %v2566_v49, %v2562_v37  ;;  %v2893_v44 = vsel %vm2489_vm12, %v2892_v60, %v2888_v5  ;;  %v2907_v34 = vrot.slane %v2212_v6, %v4931_v48 }
 0x201   : > { %v2086_v16 = vpop.xlane.xlu0 %2085  ;;  %v2898_v12 = vsel %vm2496_vm13, %v2897_v45, %v2893_v44  ;;  %v2572_v54 = vsel %vm2482_vm11, %v2571_v17, %v2567_v55 }
 0x202   : > { %v2577_v22 = vsel %vm2489_vm12, %v2576_v61, %v2572_v54  ;;  %v2596_v4 = vrot.slane %v2086_v16, %v4928_v41 }
 0x203   : > { %v2210_v21 = vpop.xlane.xlu1 %2209  ;;  %v2582_v3 = vsel %vm2496_vm13, %v2581_v8, %v2577_v22 }
 0x204   : > { %v2902_v57 = vrot.slane %v2210_v21, %v4924_v32 }
 0x205   : > { %v2214_v63 = vpop.xlane.xlu0 %2213 }
 0x206   : > { %v2912_v20 = vrot.slane %v2214_v63, %v4928_v41  ;;  %v2903_v2 = vsel %vm2503_vm14, %v2902_v57, %v2898_v12 }
 0x207   : > { %v2908_v9 = vsel %vm2510_vm15, %v2907_v34, %v2903_v2  ;;  %v2094_v31 = vpop.xlane.xlu1 %2093 }
 0x208   : > { %v5066_v62 = vsel %vm2517_vm0, %v2912_v20, %v2908_v9  ;;  %v2615_v49 = vrot.slane %v2094_v31, %v4700_v39 }
 0x209   : > { %v2082_v29 = vpop.xlane.xlu0 %2081 }
 0x20a   : > { %v2586_v13 = vrot.slane %v2082_v29, %v4924_v32 }
 0x20b   : > { %v2222_v10 = vpop.xlane.xlu1 %2221 }
 0x20c   : > { %v2587_v42 = vsel %vm2503_vm14, %v2586_v13, %v2582_v3  ;;  %v2931_v55 = vrot.slane %v2222_v10, %v4700_v39 }
 0x20d   : > { %v2592_v52 = vsel %vm2510_vm15, %v2591_v53, %v2587_v42  ;;  %v2092_v23 = vpop.xlane.xlu0 %2091 }
 0x20e   : > { %v2597_v47 = vsel %vm2517_vm0, %v2596_v4, %v2592_v52  ;;  %v2610_v16 = vrot.slane %v2092_v23, %v4684_v7 }
 0x20f   : > { %v5072_v58 = vsel %vm3072_vm1, %v2597_v47, %v4948_v24  ;;  %v2090_v27 = vpop.xlane.xlu1 %2089  ;;  %vm3074_vm1 = vcmask 1042434  }
 0x210   : > { %v2605_v56 = vrot.slane %v2090_v27, %v4695_v1 }
 0x211   : > { %v2220_v11 = vpop.xlane.xlu0 %2219 }
 0x212   : > { %v2926_v6 = vrot.slane %v2220_v11, %v4684_v7 }
 0x213   : > { %v2218_v60 = vpop.xlane.xlu1 %2217 }
 0x214   : > { %v2921_v24 = vrot.slane %v2218_v60, %v4695_v1 }
 0x215   : > { %v2088_v30 = vpop.xlane.xlu0 %2087 }
 0x216   : > { %v2601_v45 = vrot.slane %v2088_v30, %v4688_v28 }
 0x217   : > { %v2228_v61 = vpop.xlane.xlu1 %2227 }
 0x218   : > { %v2606_v40 = vsel %vm2419_vm2, %v2605_v56, %v2601_v45  ;;  %v2946_v27 = vrot.slane %v2228_v61, %v4703_v25 }
 0x219   : > { %v2611_v0 = vsel %vm2426_vm3, %v2610_v16, %v2606_v40  ;;  %v2216_v17 = vpop.xlane.xlu0 %2215 }
 0x21a   : > { %v2917_v37 = vrot.slane %v2216_v17, %v4688_v28  ;;  %v2616_v5 = vsel %vm2433_vm4, %v2615_v49, %v2611_v0 }
 0x21b   : > { %v2096_v54 = vpop.xlane.xlu1 %2095 }
 0x21c   : > { %v2922_v44 = vsel %vm2419_vm2, %v2921_v24, %v2917_v37  ;;  %v2620_v22 = vrot.slane %v2096_v54, %v4706_v26 }
 0x21d   : > { %v2927_v8 = vsel %vm2426_vm3, %v2926_v6, %v2922_v44  ;;  %v2100_v12 = vpop.xlane.xlu0 %2099 }
 0x21e   : > { %v2932_v63 = vsel %vm2433_vm4, %v2931_v55, %v2927_v8  ;;  %v2621_v3 = vsel %vm2440_vm5, %v2620_v22, %v2616_v5  ;;  %v2630_v20 = vrot.slane %v2100_v12, %v4703_v25 }
 0x21f   : > { %v2224_v34 = vpop.xlane.xlu1 %2223 }
 0x220   : > { %v2936_v29 = vrot.slane %v2224_v34, %v4706_v26 }
 0x221   : > { %v2098_v21 = vpop.xlane.xlu0 %2097 }
 0x222   : > { %v2625_v57 = vrot.slane %v2098_v21, %v4712_v43  ;;  %v2937_v9 = vsel %vm2440_vm5, %v2936_v29, %v2932_v63 }
 0x223   : > { %v2102_v31 = vpop.xlane.xlu1 %2101 }
 0x224   : > { %v2626_v2 = vsel %vm2447_vm6, %v2625_v57, %v2621_v3  ;;  %v2635_v4 = vrot.slane %v2102_v31, %v4761_v50 }
 0x225   : > { %v2631_v13 = vsel %vm2454_vm7, %v2630_v20, %v2626_v2  ;;  %v2240_v53 = vpop.xlane.xlu0 %2239 }
 0x226   : > { %v2636_v52 = vsel %vm2461_vm8, %v2635_v4, %v2631_v13 }
 0x227   : > { %v2230_v23 = vpop.xlane.xlu1 %2229 }
 0x228   : > { %v2951_v56 = vrot.slane %v2230_v23, %v4761_v50  ;;  %v2976_v23 = vrot.slane %v2240_v53, %v4887_v18 }
 0x229   : > { %v2242_v42 = vpop.xlane.xlu0 %2241 }
 0x22b   : > { %v2226_v10 = vpop.xlane.xlu1 %2225 }
 0x22c   : > { %v2941_v11 = vrot.slane %v2226_v10, %v4712_v43 }
 0x22d   : > { %v5098_v47 = vpop.xlane.xlu0 %2123 }
 0x22e   : > { %v2942_v45 = vsel %vm2447_vm6, %v2941_v11, %v2937_v9 }
 0x22f   : > { %v2947_v16 = vsel %vm2454_vm7, %v2946_v27, %v2942_v45  ;;  %v2108_v60 = vpop.xlane.xlu1 %2107  ;;  %v2981_v27 = vrot.slane %v2242_v42, %v4924_v32 }
 0x230   : > { %v2952_v49 = vsel %vm2461_vm8, %v2951_v56, %v2947_v16  ;;  %v2650_v22 = vrot.slane %v2108_v60, %v4834_v51 }
 0x231   : > { %v5102_v30 = vpop.xlane.xlu0 %2251 }
 0x233   : > { %v2236_v0 = vpop.xlane.xlu1 %2235 }
 0x234   : > { %v2966_v13 = vrot.slane %v2236_v0, %v4834_v51 }
 0x235   : > { %v5108_v40 = vpop.xlane.xlu0 %2125 }
 0x237   : > { %v2104_v24 = vpop.xlane.xlu1 %2103 }
 0x238   : > { %v2640_v8 = vrot.slane %v2104_v24, %v4774_v59 }
 0x239   : > { %v5110_v17 = vpop.xlane.xlu0 %2253 }
 0x23a   : > { %v2641_v21 = vsel %vm2468_vm9, %v2640_v8, %v2636_v52 }
 0x23b   : > { %v2232_v5 = vpop.xlane.xlu1 %2231 }
 0x23c   : > { %v2956_v3 = vrot.slane %v2232_v5, %v4774_v59 }
 0x23d   : > { %v5112_v37 = vpop.xlane.xlu0 %2121 }
 0x23e   : > { %v2957_v9 = vsel %vm2468_vm9, %v2956_v3, %v2952_v49 }
 0x23f   : > { %v2110_v61 = vpop.xlane.xlu1 %2109 }
 0x240   : > { %v2655_v42 = vrot.slane %v2110_v61, %v4840_v19 }
 0x241   : > { %v2250_v6 = vpop.xlane.xlu0 %2249 }
 0x243   : > { %v2238_v44 = vpop.xlane.xlu1 %2237 }
 0x244   : > { %v2971_v4 = vrot.slane %v2238_v44, %v4840_v19 }
 0x245   : > { %v5114_v55 = vpop.xlane.xlu0 %2131 }
 0x247   : > { %v2106_v63 = vpop.xlane.xlu1 %2105 }
 0x248   : > { %v2645_v54 = vrot.slane %v2106_v63, %v4831_v36 }
 0x249   : > { %v5117_v12 = vpop.xlane.xlu0 %2259 }
 0x24a   : > { %v2646_v20 = vsel %vm2475_vm10, %v2645_v54, %v2641_v21 }
 0x24b   : > { %v2651_v34 = vsel %vm2482_vm11, %v2650_v22, %v2646_v20  ;;  %v2234_v29 = vpop.xlane.xlu1 %2233 }
 0x24c   : > { %v2961_v2 = vrot.slane %v2234_v29, %v4831_v36  ;;  %v2656_v54 = vsel %vm2489_vm12, %v2655_v42, %v2651_v34 }
 0x24d   : > { %v2256_v57 = vpop.xlane.xlu0 %2255 }
 0x24e   : > { %v2962_v52 = vsel %vm2475_vm10, %v2961_v2, %v2957_v9 }
 0x24f   : > { %v2967_v10 = vsel %vm2482_vm11, %v2966_v13, %v2962_v52  ;;  %v2116_v11 = vpop.xlane.xlu1 %2115 }
 0x250   : > { %v2972_v56 = vsel %vm2489_vm12, %v2971_v4, %v2967_v10  ;;  %v2670_v21 = vrot.slane %v2116_v11, %v4931_v48  ;;  %v2684_v10 = vrot.slane %v5112_v37, %v4695_v1  ;;  %v3000_v11 = vrot.slane %v2250_v6, %v4695_v1 }
 0x251   : > { %v5128_v31 = vpop.xlane.xlu0 %2133  ;;  %v2977_v45 = vsel %vm2496_vm13, %v2976_v23, %v2972_v56  ;;  %v3005_v56 = vrot.slane %v5102_v30, %v4684_v7  ;;  %v3015_v37 = vrot.slane %v2256_v57, %v4706_v26 }
 0x252   : > { %v5138_v60 = vsel %vm2503_vm14, %v2981_v27, %v2977_v45 }
 0x253   : > { %v5140_v49 = vpop.xlane.xlu1 %2243 }
 0x255   : > { %v2262_v16 = vpop.xlane.xlu0 %2261 }
 0x257   : > { %v2112_v24 = vpop.xlane.xlu1 %2111 }
 0x258   : > { %v2660_v44 = vrot.slane %v2112_v24, %v4887_v18  ;;  %v3010_v24 = vrot.slane %v5110_v17, %v4700_v39 }
 0x259   : > { %v2258_v0 = vpop.xlane.xlu0 %2257 }
 0x25a   : > { %v2661_v3 = vsel %vm2496_vm13, %v2660_v44, %v2656_v54  ;;  %v2689_v44 = vrot.slane %v5098_v47, %v4684_v7  ;;  %v3025_v7 = vrot.slane %v5117_v12, %v4703_v25 }
 0x25b   : > { %v2118_v53 = vpop.xlane.xlu1 %2117 }
 0x25c   : > { %v2675_v29 = vrot.slane %v2118_v53, %v4928_v41 }
 0x25d   : > { %v5142_v5 = vpop.xlane.xlu0 %2139 }
 0x25f   : > { %v2114_v63 = vpop.xlane.xlu1 %2113 }
 0x260   : > { %v2665_v22 = vrot.slane %v2114_v63, %v4924_v32 }
 0x261   : > { %v5145_v8 = vpop.xlane.xlu0 %2267 }
 0x262   : > { %v2666_v2 = vsel %vm2503_vm14, %v2665_v22, %v2661_v3  ;;  %v2694_v22 = vrot.slane %v5108_v40, %v4700_v39  ;;  %v2714_v40 = vrot.slane %v5128_v31, %v4761_v50 }
 0x263   : > { %v2671_v13 = vsel %vm2510_vm15, %v2670_v21, %v2666_v2  ;;  %v2120_v9 = vpop.xlane.xlu1 %2119 }
 0x264   : > { %v2676_v61 = vsel %vm2517_vm0, %v2675_v29, %v2671_v13  ;;  %v2680_v52 = vrot.slane %v2120_v9, %v4688_v28  ;;  %v2709_v29 = vrot.slane %v5114_v55, %v4703_v25 }
 0x265   : > { %v2136_v20 = vpop.xlane.xlu0 %2135  ;;  %v5157_v4 = vsel %vm3074_vm1, %v2676_v61, %v5072_v58 }
 0x266   : > { %v2685_v58 = vsel %vm2419_vm2, %v2684_v10, %v2680_v52  ;;  %v2719_v13 = vrot.slane %v2136_v20, %v4774_v59 }
 0x267   : > { %v2248_v23 = vpop.xlane.xlu1 %2247  ;;  %v2690_v42 = vsel %vm2426_vm3, %v2689_v44, %v2685_v58  ;;  %v2749_v58 = vrot.slane %v4664_v14, %v4931_v48 }
 0x268   : > { %v2996_v27 = vrot.slane %v2248_v23, %v4688_v28  ;;  %v3020_v28 = vrot.slane %v2258_v0, %v4712_v43  ;;  %v2695_v21 = vsel %vm2433_vm4, %v2694_v22, %v2690_v42 }
 0x269   : > { %v2264_v34 = vpop.xlane.xlu0 %2263 }
 0x26a   : > { %v3001_v53 = vsel %vm2419_vm2, %v3000_v11, %v2996_v27  ;;  %v3035_v25 = vrot.slane %v2264_v34, %v4774_v59  ;;  %v2739_v27 = vrot.slane %v4639_v15, %v4887_v18  ;;  %vm3076_vm2 = vcmask 1043459  }
 0x26b   : > { %v3006_v1 = vsel %vm2426_vm3, %v3005_v56, %v3001_v53  ;;  %v2128_v6 = vpop.xlane.xlu1 %2127  ;;  %v3045_v56 = vrot.slane %v5145_v8, %v4834_v51  ;;  %vm3078_vm3 = vcmask 1044484  }
 0x26c   : > { %v3011_v30 = vsel %vm2433_vm4, %v3010_v24, %v3006_v1  ;;  %v2699_v63 = vrot.slane %v2128_v6, %v4706_v26  ;;  %v3030_v26 = vrot.slane %v2262_v16, %v4761_v50  ;;  %v2729_v50 = vrot.slane %v5142_v5, %v4834_v51 }
 0x26d   : > { %v2142_v45 = vpop.xlane.xlu0 %2141  ;;  %v3016_v17 = vsel %vm2440_vm5, %v3015_v37, %v3011_v30  ;;  %v2744_v5 = vrot.slane %v4652_v35, %v4924_v32  ;;  %v2986_v37 = vrot.slane %v5140_v49, %v4931_v48  ;;  %vm3080_vm4 = vcmask 1045509  }
 0x26e   : > { %v3021_v47 = vsel %vm2447_vm6, %v3020_v28, %v3016_v17  ;;  %v2700_v2 = vsel %vm2440_vm5, %v2699_v63, %v2695_v21  ;;  %v2734_v10 = vrot.slane %v2142_v45, %v4840_v19  ;;  %v2754_v45 = vrot.slane %v4644_v38, %v4928_v41 }
 0x26f   : > { %v2130_v57 = vpop.xlane.xlu1 %2129  ;;  %v3026_v0 = vsel %vm2454_vm7, %v3025_v7, %v3021_v47  ;;  %vm3082_vm5 = vcmask 1046534   ;;  %v2987_v42 = vsel %vm2510_vm15, %v2986_v37, %v5138_v60 }
 0x270   : > { %v2704_v3 = vrot.slane %v2130_v57, %v4712_v43  ;;  %v3031_v9 = vsel %vm2461_vm8, %v3030_v26, %v3026_v0 }
 0x271   : > { %v2138_v54 = vpop.xlane.xlu0 %2137  ;;  %v3036_v20 = vsel %vm2468_vm9, %v3035_v25, %v3031_v9 }
 0x272   : > { %v2705_v12 = vsel %vm2447_vm6, %v2704_v3, %v2700_v2  ;;  %v2724_v16 = vrot.slane %v2138_v54, %v4831_v36  ;;  %vm3084_vm6 = vcmask 1047559  }
 0x273   : > { %v2710_v61 = vsel %vm2454_vm7, %v2709_v29, %v2705_v12  ;;  %v2246_v43 = vpop.xlane.xlu1 %2245  ;;  %vm2281_vm7 = vcmp.lt.s32.totalorder %v4650_v46, 8 }
 0x274   : > { %v2715_v55 = vsel %vm2461_vm8, %v2714_v40, %v2710_v61  ;;  %v2991_v8 = vrot.slane %v2246_v43, %v4928_v41 }
 0x275   : > { %v2266_v39 = vpop.xlane.xlu0 %2265  ;;  %v2720_v31 = vsel %vm2468_vm9, %v2719_v13, %v2715_v55 }
 0x276   : > { %v3040_v52 = vrot.slane %v2266_v39, %v4831_v36  ;;  %v2725_v11 = vsel %vm2475_vm10, %v2724_v16, %v2720_v31 }
 0x277   : > { %v2730_v59 = vsel %vm2482_vm11, %v2729_v50, %v2725_v11  ;;  %v2270_v36 = vpop.xlane.xlu1 %2269 }
 0x278   : > { %v3041_v34 = vsel %vm2475_vm10, %v3040_v52, %v3036_v20  ;;  %v2735_v24 = vsel %vm2489_vm12, %v2734_v10, %v2730_v59  ;;  %v3050_v53 = vrot.slane %v2270_v36, %v4840_v19 }
 0x279   : > { %v2274_v23 = vpop.xlane.xlu0 %2273  ;;  %v2740_v15 = vsel %vm2496_vm13, %v2739_v27, %v2735_v24  ;;  %v3046_v51 = vsel %vm2482_vm11, %v3045_v56, %v3041_v34 }
 0x27a   : > { %v2745_v35 = vsel %vm2503_vm14, %v2744_v5, %v2740_v15  ;;  %v3051_v49 = vsel %vm2489_vm12, %v3050_v53, %v3046_v51  ;;  %v3060_v28 = vrot.slane %v2274_v23, %v4924_v32 }
 0x27b   : > { %v2272_v1 = vpop.xlane.xlu1 %2271  ;;  %v2750_v38 = vsel %vm2510_vm15, %v2749_v58, %v2745_v35 }
 0x27c   : > { %v3055_v14 = vrot.slane %v2272_v1, %v4887_v18  ;;  %v2755_v19 = vsel %vm2517_vm0, %v2754_v45, %v2750_v38  ;;  %v2992_v18 = vsel %vm2517_vm0, %v2991_v8, %v2987_v42 }
 0x27d   : > { %v2276_v44 = vpop.xlane.xlu0 %2275  ;;  %v3077_v30 = vsel %vm3076_vm2, %v2755_v19, %v5157_v4 }
 0x27e   : > { %v3065_v6 = vrot.slane %v2276_v44, %v4931_v48  ;;  %v3056_v17 = vsel %vm2496_vm13, %v3055_v14, %v3051_v49  ;;  %v3079_v63 = vsel %vm3078_vm3, %v4966_v33, %v3077_v30 }
 0x27f   : > { %v3061_v48 = vsel %vm2503_vm14, %v3060_v28, %v3056_v17  ;;  %v2278_v54 = vpop.xlane.xlu1 %2277  ;;  %v3081_v22 = vsel %vm3080_vm4, %v5066_v62, %v3079_v63 }
 0x280   : > { %v3066_v7 = vsel %vm2510_vm15, %v3065_v6, %v3061_v48  ;;  %v3070_v32 = vrot.slane %v2278_v54, %v4928_v41  ;;  %v3083_v4 = vsel %vm3082_vm5, %v2992_v18, %v3081_v22 }
 0x282   : > { %v3071_v60 = vsel %vm2517_vm0, %v3070_v32, %v3066_v7 }
 0x283   : > { %v3085_v33 = vsel %vm3084_vm6, %v3071_v60, %v3083_v4 }
 0x284   : > { %v3087_v47 = vsel %vm2281_vm7, %v3085_v33, -1e+30 }
 0x285   : > { %3088 = vmax.xlane.f32.xlu0 %v3087_v47 }
 0x30e   : > { %v3089_v57 = vpop.xlane.xlu0 %3088 }
 0x30f   : > { %v3090_v0 = vsub.f32 %v3087_v47, %v3089_v57 }
 0x311   : > { %v3091_v21 = vmul.f32 1.442695, %v3090_v0 }
 0x313   : > { %3911 = vpow2.f32 %v3091_v21 }
 0x320   : > { %v3912_v62 = vpop.eup %3911 }
 0x321   : > { %3093 = vadd.xlane.f32.xlu1 %v3912_v62 }
 0x3aa   : > { %v3094_v3 = vpop.xlane.xlu1 %3093 }
 0x3ab   : > { %3913 = vrcp.f32 %v3094_v3 }
 0x3b8   : > { %v3914_v46 = vpop.eup %3913 }
 0x3b9   : > { %v3096_v41 = vmul.f32 %v3914_v46, %v3912_v62 }
 0x3bb   : > { %3097 = vst [vmem:[%s260_s26] sm:$0xff] %v3096_v41 }
 0x3bc   : > { %3929 = shalt.err (!%p3926_p4)
}
 0x3bd   : > { %s3930_s15 = scalar_lea.hbm %s3110_s10, 128  ;;  %s3934_s18 = scalar_lea.hbm %s5285_s6, 256 }
 0x3be   : > { %p3931_p7 = scmp.ne.s32.totalorder %s3110_s10, %s3930_s15  ;;  %p3935_p10 = scmp.lt.s32.totalorder %s3110_s10, %s5285_s6 }
 0x3bf   : > { %p3936_p11 = scmp.lt.s32.totalorder %s3934_s18, %s3930_s15 }
 0x3c0   : > { %p3932_p8 = pnand %p3931_p7, %p4055_p5 }
 0x3c1   : > { %p3937_p12 = por %p3936_p11, %p3935_p10 }
 0x3c2   : > { %p3933_p9 = pneg %p3932_p8 }
 0x3c4   : > { %p3938_p13 = pnand %p3937_p12, %p3933_p9 }
 0x3c6   : > { %3941 = shalt.err (!%p3938_p13)
}
 0x3c7   : > { %3545 = dma.vmem_to_hbm [thread:$0]  (%p4055_p5), %s3113_s28, 128, %s3110_s10, %s3099_s11  }
 0x3c8 PF: > { %p3551_p0 = scmp.ge.s32.totalorder %s3976_s24, 2  ;;  %s3124_s26 = sand.u32 1, %s3964_s21  }
 0x3c9   : > { %s3125_s29 = scalar_lea.sflag [#allocation3], %s3124_s26 }
 0x3ca   : > { %p3548_p1 = pnand %p3551_p0, %p4059_p6 }
 0x3cc   : > { %p3549_p2 = pneg %p3548_p1 }
 0x3ce   : > { %3959 = dma.done.wait (%p3549_p2), %s3125_s29, 128  }
 0x3cf   : > { %3961 = vsyncadd (%p3549_p2), %s3125_s29, 4294967168  ;;  %p16_p3 = scmp.ge.s32.totalorder %s4042_s27, 4   ;;  %s5288_s21 = smov %s3968_s22 }
 0x3d0   : > { %s5289_s22 = smov %s3972_s23  ;;  %s5290_s23 = smov %s4053_s30 }
 0x3d1   : > { %s5291_s24 = smov %s4042_s27  ;;  %18 = sbr.rel (!%p16_p3) target bundleno = 3 (0x3), region = 82 }
 0x3d6   :  { %3130 = vsyncpa [#allocation3], 1 }
 0x3d7   :  { %3132 = vsyncpa [#allocation3 + $0x1], 1 }

</bundles_post_ra>
